<compile_context>
chip_gen: v7x
topology: tpu7x:2x2x1
jax: 0.10.0
libtpu: 0.0.40
codegen_flags: <defaults>
</compile_context>

<pallas_src>
import numpy as np
import jax
import jax.numpy as jnp
from jax.experimental import pallas as pl
from jax.experimental.pallas import tpu as pltpu


# ----------------------------- Fused CBAM kernel ------------------------------
def cbam_kernel(x_ref, w1_ref, b1_ref, w2_ref, b2_ref, mmax_ref, mmean_ref,
                bnb_ref, out_ref):
    x = x_ref[0].astype(jnp.float32)                       # (C, S), f32 compute

    # ---------------- ChannelGate ----------------
    avg = jnp.mean(x, axis=1, keepdims=True)               # (C, 1)
    mx = jnp.max(x, axis=1, keepdims=True)                 # (C, 1)
    # The shared MLP acts column-wise, so applying it once to the concatenated
    # (C, 2) matrix and summing the two output columns is mathematically
    # identical to mlp(avg_pool) + mlp(max_pool) in the PyTorch reference.
    pooled = jnp.concatenate([avg, mx], axis=1)            # (C, 2)
    h = jnp.dot(w1_ref[...], pooled,
                preferred_element_type=jnp.float32) + b1_ref[...]     # (Cr, 2)
    h = jnp.maximum(h, 0.0)
    att = jnp.dot(w2_ref[...], h,
                  preferred_element_type=jnp.float32) + b2_ref[...]   # (C, 2)
    cscale = jax.nn.sigmoid(att[:, 0:1] + att[:, 1:2])     # (C, 1)
    y = x * cscale                                         # (C, S), stays in VMEM

    # ---------------- SpatialGate (fused) ----------------
    # ChannelPool: row 0 = max over C, row 1 = mean over C.  This ordering must
    # stay matched to the conv operator's input-channel order (mmax / mmean).
    cp_max = jnp.max(y, axis=0, keepdims=True)             # (1, S)
    cp_mean = jnp.mean(y, axis=0, keepdims=True)           # (1, S)
    # 7x7x7 'same' conv (+ folded BatchNorm scale) as two Toeplitz matmuls.
    conv = (jnp.dot(cp_max, mmax_ref[...], preferred_element_type=jnp.float32) +
            jnp.dot(cp_mean, mmean_ref[...], preferred_element_type=jnp.float32))
    sscale = jax.nn.sigmoid(conv + bnb_ref[0])             # (1, S)

    out_ref[0] = (y * sscale).astype(out_ref.dtype)


def cbam_call(xf, w1, b1_col, w2, b2_col, m_max, m_mean, bn_b):
    B, C, S = xf.shape
    Cr = w1.shape[0]
    return pl.pallas_call(
        cbam_kernel,
        out_shape=jax.ShapeDtypeStruct((B, C, S), xf.dtype),
        grid=(B,),
        in_specs=[
            pl.BlockSpec((1, C, S), lambda b: (b, 0, 0)),      # x (bf16)
            pl.BlockSpec((Cr, C), lambda b: (0, 0)),           # w1
            pl.BlockSpec((Cr, 1), lambda b: (0, 0)),           # b1
            pl.BlockSpec((C, Cr), lambda b: (0, 0)),           # w2
            pl.BlockSpec((C, 1), lambda b: (0, 0)),            # b2
            pl.BlockSpec((S, S), lambda b: (0, 0)),            # Toeplitz (max row)
            pl.BlockSpec((S, S), lambda b: (0, 0)),            # Toeplitz (mean row)
            pl.BlockSpec(memory_space=pltpu.MemorySpace.SMEM), # bn_b scalar
        ],
        out_specs=pl.BlockSpec((1, C, S), lambda b: (b, 0, 0)),
        compiler_params=pltpu.CompilerParams(dimension_semantics=("parallel",)),
    )(xf, w1, b1_col, w2, b2_col, m_max, m_mean, bn_b)


def cbam_forward(x, w1, b1, w2, b2, m_max, m_mean, bn_b):
    B, C, D, H, W = x.shape
    xf = x.reshape(B, C, D * H * W)                        # free metadata reshape
    out = cbam_call(xf, w1, b1.reshape(-1, 1), w2, b2.reshape(-1, 1),
                    m_max, m_mean, bn_b)
    return out.reshape(B, C, D, H, W)


# ------------------- Host-side conv -> Toeplitz operator ----------------------
def build_spatial_conv_operator(wconv_scaled, D, H, W):
    """Sparse-Toeplitz operator for a K^3 'same' conv on the flattened spatial
    axis:  conv[s_out] = sum_c sum_{s_in} cp[c, s_in] * M[c, s_in, s_out].
    wconv_scaled: numpy (2, K, K, K) conv weights with the BN scale folded in."""
    K = wconv_scaled.shape[-1]
    pad = (K - 1) // 2
    S = D * H * W
    M = np.zeros((2, S, S), np.float32)
    d_o, h_o, w_o = np.meshgrid(np.arange(D), np.arange(H), np.arange(W),
                                indexing="ij")
    s_out = (d_o * H * W + h_o * W + w_o).ravel()
    for kd in range(K):
        for kh in range(K):
            for kw in range(K):
                d_i = d_o + kd - pad
                h_i = h_o + kh - pad
                w_i = w_o + kw - pad
                valid = ((d_i >= 0) & (d_i < D) & (h_i >= 0) & (h_i < H) &
                         (w_i >= 0) & (w_i < W)).ravel()
                s_in = (d_i * H * W + h_i * W + w_i).ravel()
                si, so = s_in[valid], s_out[valid]
                M[0, si, so] = wconv_scaled[0, kd, kh, kw]
                M[1, si, so] = wconv_scaled[1, kd, kh, kw]
    return M


# ----------------------------- Pure-JAX reference -----------------------------
def cbam_reference(x, w1, b1, w2, b2, wconv, bn_a, bn_b):
    B, C, D, H, W = x.shape
    xf = x.reshape(B, C, -1)

    def mlp(v):  # v: (B, C)
        h = jnp.maximum(v @ w1.T + b1, 0.0)
        return h @ w2.T + b2

    att = mlp(xf.mean(axis=-1)) + mlp(xf.max(axis=-1))
    y = x * jax.nn.sigmoid(att)[:, :, None, None, None]

    cp = jnp.stack([y.max(axis=1), y.mean(axis=1)], axis=1)  # (B, 2, D, H, W)
    conv = jax.lax.conv_general_dilated(
        cp, wconv, window_strides=(1, 1, 1), padding=[(3, 3)] * 3,
        dimension_numbers=("NCDHW", "OIDHW", "NCDHW"))
    scale = jax.nn.sigmoid(conv * bn_a + bn_b)
    return y * scale


# ----------------------------- main -------------------------------------------
if __name__ == "__main__":
    B, C, D, H, W = 2, 32, 8, 8, 8
    reduction_ratio = 16
    Cr = C // reduction_ratio
    S = D * H * W

    key = jax.random.PRNGKey(0)
    k = jax.random.split(key, 6)
    x = jax.random.normal(k[0], (B, C, D, H, W), jnp.float32)

    # Deterministic parameter init (PyTorch layouts).
    w1 = jax.random.normal(k[1], (Cr, C), jnp.float32) * 0.2      # Linear(C -> C//r)
    b1 = jax.random.normal(k[2], (Cr,), jnp.float32) * 0.1
    w2 = jax.random.normal(k[3], (C, Cr), jnp.float32) * 0.2      # Linear(C//r -> C)
    b2 = jax.random.normal(k[4], (C,), jnp.float32) * 0.1
    wconv = jax.random.normal(k[5], (1, 2, 7, 7, 7), jnp.float32) * 0.05

    # BatchNorm3d(1) in eval mode with fresh init: gamma=1, beta=0, rm=0, rv=1.
    gamma, beta, rmean, rvar, eps = 1.0, 0.0, 0.0, 1.0, 1e-5
    bn_a = gamma / np.sqrt(rvar + eps)
    bn_b = beta - rmean * bn_a

    # Fold the BN scale into the conv weights, build the Toeplitz operators,
    # pass the BN bias as a single SMEM scalar.
    m = build_spatial_conv_operator(np.asarray(wconv)[0] * bn_a, D, H, W)
    m_max, m_mean = jnp.asarray(m[0]), jnp.asarray(m[1])
    bn_b_arr = jnp.full((1,), bn_b, jnp.float32)

    # bf16 storage for the large tensors; all kernel math is f32.
    x_bf = x.astype(jnp.bfloat16)

    out = jax.jit(cbam_forward)(x_bf, w1, b1, w2, b2, m_max, m_mean, bn_b_arr)
    out = jax.block_until_ready(out)

    ref = cbam_reference(x_bf.astype(jnp.float32), w1, b1, w2, b2, wconv,
                         bn_a, bn_b)
    ref = jax.block_until_ready(ref)

    # Tolerance covers only the final bf16 output-store rounding (~2^-8 rel).
    np.testing.assert_allclose(np.asarray(out.astype(jnp.float32)),
                               np.asarray(ref), rtol=2e-2, atol=2e-2)
    print("KERNEL_OK")
</pallas_src>

<mosaic_0001>
module attributes {stable_mosaic.version = 11 : i64} {
  func.func @cbam_kernel(%arg0: i32, %arg1: memref<1x32x512xbf16, #tpu.memory_space<vmem>>, %arg2: memref<2x32xf32, #tpu.memory_space<vmem>>, %arg3: memref<2x1xf32, #tpu.memory_space<vmem>>, %arg4: memref<32x2xf32, #tpu.memory_space<vmem>>, %arg5: memref<32x1xf32, #tpu.memory_space<vmem>>, %arg6: memref<512x512xf32, #tpu.memory_space<vmem>>, %arg7: memref<512x512xf32, #tpu.memory_space<vmem>>, %arg8: memref<1xf32, #tpu.memory_space<smem>>, %arg9: memref<1x32x512xbf16, #tpu.memory_space<vmem>>) attributes {dimension_semantics = [#tpu.dimension_semantics<parallel>], iteration_bounds = array<i64: 2>, scalar_prefetch = 0 : i64, scratch_operands = 0 : i64, tpu.core_type = #tpu.core_type<tc>, window_params = [{transform_indices = @transform_0, window_bounds = array<i64: 1, 32, 512>}, {pipeline_mode = #tpu.pipeline_mode<synchronous>, transform_indices = @transform_1, window_bounds = array<i64: 2, 32>}, {pipeline_mode = #tpu.pipeline_mode<synchronous>, transform_indices = @transform_2, window_bounds = array<i64: 2, 1>}, {pipeline_mode = #tpu.pipeline_mode<synchronous>, transform_indices = @transform_3, window_bounds = array<i64: 32, 2>}, {pipeline_mode = #tpu.pipeline_mode<synchronous>, transform_indices = @transform_4, window_bounds = array<i64: 32, 1>}, {pipeline_mode = #tpu.pipeline_mode<synchronous>, transform_indices = @transform_5, window_bounds = array<i64: 512, 512>}, {pipeline_mode = #tpu.pipeline_mode<synchronous>, transform_indices = @transform_6, window_bounds = array<i64: 512, 512>}, {transform_indices = @transform_7, window_bounds = array<i64: 1>}, {transform_indices = @transform_8, window_bounds = array<i64: 1, 32, 512>}]} {
    %c0 = arith.constant 0 : index
    %c0_0 = arith.constant 0 : index
    %c0_1 = arith.constant 0 : index
    %0 = vector.load %arg1[%c0, %c0_0, %c0_1] : memref<1x32x512xbf16, #tpu.memory_space<vmem>>, vector<1x32x512xbf16>
    %1 = vector.shape_cast %0 : vector<1x32x512xbf16> to vector<32x512xbf16>
    %2 = arith.extf %1 : vector<32x512xbf16> to vector<32x512xf32>
    %cst = arith.constant dense<0.000000e+00> : vector<32xf32>
    %3 = vector.multi_reduction <add>, %2, %cst [1] : vector<32x512xf32> to vector<32xf32>
    %4 = vector.shape_cast %3 : vector<32xf32> to vector<32x1xf32>
    %cst_2 = arith.constant 5.120000e+02 : f32
    %5 = vector.broadcast %cst_2 : f32 to vector<32x1xf32>
    %6 = arith.divf %4, %5 : vector<32x1xf32>
    %cst_3 = arith.constant dense<0xFF800000> : vector<32xf32>
    %7 = vector.multi_reduction <maximumf>, %2, %cst_3 [1] : vector<32x512xf32> to vector<32xf32>
    %8 = vector.shape_cast %7 : vector<32xf32> to vector<32x1xf32>
    %9 = tpu.concatenate %6, %8 in 1 : vector<32x1xf32>, vector<32x1xf32> -> vector<32x2xf32>
    %c0_4 = arith.constant 0 : index
    %c0_5 = arith.constant 0 : index
    %10 = vector.load %arg2[%c0_4, %c0_5] : memref<2x32xf32, #tpu.memory_space<vmem>>, vector<2x32xf32>
    %cst_6 = arith.constant dense<0.000000e+00> : vector<2x2xf32>
    %11 = tpu.matmul %10, %9, %cst_6 {dimension_numbers = #tpu.dot_dimension_numbers<[1], [0], [0], [1], [0, 0, 1, 1], [], []>} : vector<2x32xf32>, vector<32x2xf32>, vector<2x2xf32> -> vector<2x2xf32>
    %c0_7 = arith.constant 0 : index
    %c0_8 = arith.constant 0 : index
    %12 = vector.load %arg3[%c0_7, %c0_8] : memref<2x1xf32, #tpu.memory_space<vmem>>, vector<2x1xf32>
    %13 = vector.broadcast %12 : vector<2x1xf32> to vector<2x2xf32>
    %14 = arith.addf %11, %13 : vector<2x2xf32>
    %cst_9 = arith.constant 0.000000e+00 : f32
    %15 = vector.broadcast %cst_9 : f32 to vector<2x2xf32>
    %16 = arith.maximumf %14, %15 : vector<2x2xf32>
    %c0_10 = arith.constant 0 : index
    %c0_11 = arith.constant 0 : index
    %17 = vector.load %arg4[%c0_10, %c0_11] : memref<32x2xf32, #tpu.memory_space<vmem>>, vector<32x2xf32>
    %cst_12 = arith.constant dense<0.000000e+00> : vector<32x2xf32>
    %18 = tpu.matmul %17, %16, %cst_12 {dimension_numbers = #tpu.dot_dimension_numbers<[1], [0], [0], [1], [0, 0, 1, 1], [], []>} : vector<32x2xf32>, vector<2x2xf32>, vector<32x2xf32> -> vector<32x2xf32>
    %c0_13 = arith.constant 0 : index
    %c0_14 = arith.constant 0 : index
    %19 = vector.load %arg5[%c0_13, %c0_14] : memref<32x1xf32, #tpu.memory_space<vmem>>, vector<32x1xf32>
    %20 = vector.broadcast %19 : vector<32x1xf32> to vector<32x2xf32>
    %21 = arith.addf %18, %20 : vector<32x2xf32>
    %22 = vector.extract_strided_slice %21 {offsets = [0, 0], sizes = [32, 1], strides = [1, 1]} : vector<32x2xf32> to vector<32x1xf32>
    %23 = vector.extract_strided_slice %21 {offsets = [0, 1], sizes = [32, 1], strides = [1, 1]} : vector<32x2xf32> to vector<32x1xf32>
    %24 = arith.addf %22, %23 : vector<32x1xf32>
    %25 = arith.negf %24 : vector<32x1xf32>
    %26 = math.exp %25 : vector<32x1xf32>
    %cst_15 = arith.constant 1.000000e+00 : f32
    %27 = vector.broadcast %cst_15 : f32 to vector<32x1xf32>
    %28 = arith.addf %27, %26 : vector<32x1xf32>
    %29 = arith.divf %27, %28 : vector<32x1xf32>
    %30 = vector.broadcast %29 : vector<32x1xf32> to vector<32x512xf32>
    %31 = arith.mulf %2, %30 : vector<32x512xf32>
    %cst_16 = arith.constant dense<0xFF800000> : vector<512xf32>
    %32 = vector.multi_reduction <maximumf>, %31, %cst_16 [0] : vector<32x512xf32> to vector<512xf32>
    %33 = vector.shape_cast %32 : vector<512xf32> to vector<1x512xf32>
    %cst_17 = arith.constant dense<0.000000e+00> : vector<512xf32>
    %34 = vector.multi_reduction <add>, %31, %cst_17 [0] : vector<32x512xf32> to vector<512xf32>
    %35 = vector.shape_cast %34 : vector<512xf32> to vector<1x512xf32>
    %cst_18 = arith.constant 3.200000e+01 : f32
    %36 = vector.broadcast %cst_18 : f32 to vector<1x512xf32>
    %37 = arith.divf %35, %36 : vector<1x512xf32>
    %c0_19 = arith.constant 0 : index
    %c0_20 = arith.constant 0 : index
    %38 = vector.load %arg6[%c0_19, %c0_20] : memref<512x512xf32, #tpu.memory_space<vmem>>, vector<512x512xf32>
    %cst_21 = arith.constant dense<0.000000e+00> : vector<1x512xf32>
    %39 = tpu.matmul %33, %38, %cst_21 {dimension_numbers = #tpu.dot_dimension_numbers<[1], [0], [0], [1], [0, 0, 1, 1], [], []>} : vector<1x512xf32>, vector<512x512xf32>, vector<1x512xf32> -> vector<1x512xf32>
    %c0_22 = arith.constant 0 : index
    %c0_23 = arith.constant 0 : index
    %40 = vector.load %arg7[%c0_22, %c0_23] : memref<512x512xf32, #tpu.memory_space<vmem>>, vector<512x512xf32>
    %cst_24 = arith.constant dense<0.000000e+00> : vector<1x512xf32>
    %41 = tpu.matmul %37, %40, %cst_24 {dimension_numbers = #tpu.dot_dimension_numbers<[1], [0], [0], [1], [0, 0, 1, 1], [], []>} : vector<1x512xf32>, vector<512x512xf32>, vector<1x512xf32> -> vector<1x512xf32>
    %42 = arith.addf %39, %41 : vector<1x512xf32>
    %c0_25 = arith.constant 0 : index
    %43 = memref.load %arg8[%c0_25] : memref<1xf32, #tpu.memory_space<smem>>
    %44 = vector.broadcast %43 : f32 to vector<1x512xf32>
    %45 = arith.addf %42, %44 : vector<1x512xf32>
    %46 = arith.negf %45 : vector<1x512xf32>
    %47 = math.exp %46 : vector<1x512xf32>
    %cst_26 = arith.constant 1.000000e+00 : f32
    %48 = vector.broadcast %cst_26 : f32 to vector<1x512xf32>
    %49 = arith.addf %48, %47 : vector<1x512xf32>
    %50 = arith.divf %48, %49 : vector<1x512xf32>
    %51 = vector.broadcast %50 : vector<1x512xf32> to vector<32x512xf32>
    %52 = arith.mulf %31, %51 : vector<32x512xf32>
    %53 = arith.truncf %52 : vector<32x512xf32> to vector<32x512xbf16>
    %c0_27 = arith.constant 0 : index
    %c0_28 = arith.constant 0 : index
    %c0_29 = arith.constant 0 : index
    %54 = vector.load %arg9[%c0_27, %c0_28, %c0_29] : memref<1x32x512xbf16, #tpu.memory_space<vmem>>, vector<1x32x512xbf16>
    %55 = vector.shape_cast %54 : vector<1x32x512xbf16> to vector<32x512xbf16>
    %56 = vector.shape_cast %53 : vector<32x512xbf16> to vector<1x32x512xbf16>
    tpu.vector_store %arg9[%c0_27, %c0_28, %c0_29], %56 {strides = array<i32>} : memref<1x32x512xbf16, #tpu.memory_space<vmem>>, vector<1x32x512xbf16>,
    return
  }
  func.func @transform_0(%arg0: i32) -> (i32, i32, i32) {
    %c0_i32 = arith.constant 0 : i32
    %c0_i32_0 = arith.constant 0 : i32
    %c0_i32_1 = arith.constant 0 : i32
    return %arg0, %c0_i32, %c0_i32_0 : i32, i32, i32
  }
  func.func @transform_1(%arg0: i32) -> (i32, i32) {
    %c0_i32 = arith.constant 0 : i32
    %c0_i32_0 = arith.constant 0 : i32
    %c0_i32_1 = arith.constant 0 : i32
    return %c0_i32, %c0_i32_0 : i32, i32
  }
  func.func @transform_2(%arg0: i32) -> (i32, i32) {
    %c0_i32 = arith.constant 0 : i32
    %c0_i32_0 = arith.constant 0 : i32
    %c0_i32_1 = arith.constant 0 : i32
    return %c0_i32, %c0_i32_0 : i32, i32
  }
  func.func @transform_3(%arg0: i32) -> (i32, i32) {
    %c0_i32 = arith.constant 0 : i32
    %c0_i32_0 = arith.constant 0 : i32
    %c0_i32_1 = arith.constant 0 : i32
    return %c0_i32, %c0_i32_0 : i32, i32
  }
  func.func @transform_4(%arg0: i32) -> (i32, i32) {
    %c0_i32 = arith.constant 0 : i32
    %c0_i32_0 = arith.constant 0 : i32
    %c0_i32_1 = arith.constant 0 : i32
    return %c0_i32, %c0_i32_0 : i32, i32
  }
  func.func @transform_5(%arg0: i32) -> (i32, i32) {
    %c0_i32 = arith.constant 0 : i32
    %c0_i32_0 = arith.constant 0 : i32
    %c0_i32_1 = arith.constant 0 : i32
    return %c0_i32, %c0_i32_0 : i32, i32
  }
  func.func @transform_6(%arg0: i32) -> (i32, i32) {
    %c0_i32 = arith.constant 0 : i32
    %c0_i32_0 = arith.constant 0 : i32
    %c0_i32_1 = arith.constant 0 : i32
    return %c0_i32, %c0_i32_0 : i32, i32
  }
  func.func @transform_7(%arg0: i32) -> i32 {
    %c0_i32 = arith.constant 0 : i32
    %c0_i32_0 = arith.constant 0 : i32
    return %c0_i32 : i32
  }
  func.func @transform_8(%arg0: i32) -> (i32, i32, i32) {
    %c0_i32 = arith.constant 0 : i32
    %c0_i32_0 = arith.constant 0 : i32
    %c0_i32_1 = arith.constant 0 : i32
    return %arg0, %c0_i32, %c0_i32_0 : i32, i32, i32
  }
}

</mosaic_0001>

<bundles_post_ra>
// kernel: cbam_forward.1
= control target key start
LH: loop header
LB: loop body
LE: loop exit
PB: predicated region body
PF: predicated region fallthrough
CT: control target
= control target key end

     0   :  { %s3194_s0 = inlined_call_operand.vmem [shape: bf16[2,32,512], index: 0, kind: input, shape index: {}]   ;;  %s3195_s1 = inlined_call_operand.vmem [shape: f32[2,32], index: 1, kind: input, shape index: {}]   ;;  %s3196_s2 = inlined_call_operand.vmem [shape: f32[2,1], index: 2, kind: input, shape index: {}]   ;;  %s3197_s3 = inlined_call_operand.vmem [shape: f32[32,2], index: 3, kind: input, shape index: {}]   ;;  %s3198_s4 = inlined_call_operand.vmem [shape: f32[32,1], index: 4, kind: input, shape index: {}]   ;;  %s3199_s5 = inlined_call_operand.hbm [shape: f32[512,512], index: 5, kind: input, shape index: {}]   ;;  %s3200_s6 = inlined_call_operand.hbm [shape: f32[512,512], index: 6, kind: input, shape index: {}]   ;;  %s3201_s7 = inlined_call_operand.<no memory space> [shape: f32[1], index: 7, kind: input, shape index: {}]   ;;  %s3202_s8 = inlined_call_operand.vmem [shape: bf16[2,32,512], index: 8, kind: output, shape index: {}]  }
   0x1   :  { %13 = sst [smem:[#allocation2]] %s3201_s7 }
   0x2   :  { %14 = vsyncpa [#allocation4], 0 }
   0x3   :  { %15 = vsyncpa [#allocation6], 0  ;;  %s2860_s29 = smov 0  }
   0x4 LB: > { %s2866_s30 = sadd.s32 4294967295, %s2801_s29   ;;  %p2057_p0 = scmp.ge.s32.totalorder %s2801_s29, 1  ;;  %s2801_s29 = sphi %s2860_s29, %s21_s29  }
   0x5   : > { %p225_p1 = scmp.lt.s32.totalorder %s2801_s29, 3  ;;  %s2803_s9 = smov [#allocation3]  }
   0x6   : > { %s249_s7 = sshll.u32 %s2803_s9, 4  ;;  %p3203_p3 = scmp.eq.s32.totalorder %s2866_s30, 0  ;;  %s250_s7 = int_to_ptr.vmem [resolvable:$true] %s249_s7 }
   0x7   : > { %p2870_p2 = pnand %p2057_p0, %p225_p1  ;;  %s2804_s11 = smov [#allocation5]  }
   0x8   : > { %s262_s12 = sshll.u32 %s2804_s11, 4  ;;  %s2731_s16 = scalar_lea.hbm %s3199_s5, 32768  ;;  %s2883_s12 = int_to_ptr.vmem [resolvable:$true] %s262_s12 }
   0x9   : > { %s3205_s10 = scalar_select %p2870_p2, 1, 0 }
   0xa   : > { %p2669_p4 = pneg %p2870_p2  ;;  %p2732_p6 = scmp.ne.s32.totalorder %s3199_s5, %s2731_s16 }
   0xb   : > { %p2738_p10 = scmp.lt.u32.totalorder %s2731_s16, %s3199_s5 }
   0xc   : > { %p2879_p5 = pnand %p3203_p3, %p2669_p4 }
   0xe   : > { %p2733_p7 = pneg %p2879_p5 }
  0x10   : > { %p2734_p8 = pnand %p2733_p7, %p2732_p6 }
  0x12   : > { %p2735_p9 = pneg %p2734_p8 }
  0x14   : > { %p2740_p11 = pnand %p2738_p10, %p2735_p9 }
  0x16   : > { %2743 = shalt.err (!%p2740_p11)
}
  0x17   : > { %s2744_s21 = scalar_lea.vmem %s250_s7, 32768  ;;  %p2752_p1 = scmp.lt.s32.totalorder %s250_s7, %s250_s7 }
  0x18   : > { %p2745_p12 = scmp.ne.s32.totalorder %s250_s7, %s2744_s21  ;;  %p2753_p4 = scmp.lt.s32.totalorder %s2744_s21, %s2744_s21 }
  0x1a   : > { %p2747_p13 = pnand %p2745_p12, %p2733_p7  ;;  %p2754_p3 = por %p2753_p4, %p2752_p1 }
  0x1c   : > { %p2748_p0 = pneg %p2747_p13 }
  0x1e   : > { %p2755_p2 = pnand %p2754_p3, %p2748_p0 }
  0x20   : > { %2758 = shalt.err (!%p2755_p2)
}
  0x21   : > { %s2805_s22 = smov 512   ;;  %s2806_s23 = smov 32  }
  0x22   : > { %2672 = dma.hbm_to_vmem [thread:$0]  (!%p2879_p5), %s3199_s5, 32768, %s250_s7, [#allocation4], %s2805_s22, %s2805_s22, %s2806_s23  }
  0x23   : > { %s2759_s28 = scalar_lea.hbm %s3200_s6, 32768 }
  0x24   : > { %p2760_p6 = scmp.ne.s32.totalorder %s3200_s6, %s2759_s28  ;;  %p2766_p8 = scmp.lt.u32.totalorder %s2759_s28, %s3200_s6 }
  0x26   : > { %p2762_p2 = pnand %p2760_p6, %p2733_p7 }
  0x28   : > { %p2763_p3 = pneg %p2762_p2 }
  0x2a   : > { %p2768_p9 = pnand %p2766_p8, %p2763_p3 }
  0x2c   : > { %2771 = shalt.err (!%p2768_p9)
}
  0x2d   : > { %s2772_s7 = scalar_lea.vmem %s2883_s12, 32768  ;;  %p2780_p13 = scmp.lt.s32.totalorder %s2883_s12, %s2883_s12 }
  0x2e   : > { %p2773_p10 = scmp.ne.s32.totalorder %s2883_s12, %s2772_s7  ;;  %p2781_p0 = scmp.lt.s32.totalorder %s2772_s7, %s2772_s7 }
  0x30   : > { %p2775_p11 = pnand %p2773_p10, %p2733_p7  ;;  %p2782_p1 = por %p2781_p0, %p2780_p13 }
  0x32   : > { %p2776_p12 = pneg %p2775_p11 }
  0x34   : > { %p2783_p4 = pnand %p2782_p1, %p2776_p12 }
  0x36   : > { %2786 = shalt.err (!%p2783_p4)
}
  0x37   : > { %2675 = dma.hbm_to_vmem [thread:$0]  (!%p2879_p5), %s3200_s6, 32768, %s2883_s12, [#allocation6], %s2805_s22, %s2805_s22, %s2806_s23  }
  0x38   : > { %p3207_p6 = scmp.ne.s32.totalorder %s3205_s10, 0 }
  0x39   : > { %p3208_p2 = scmp.eq.s32.totalorder (!%p3207_p6), %s2866_s30, 0 }
  0x3a   : > { %289 = sbr.rel (%p3207_p6) target bundleno = 1422 (0x58e), region = 52 }
  0x41   : > { %2792 = dma.done.wait (%p3208_p2), [#allocation4], 32768   ;;  %p3209_p7 = pmov %p3208_p2 }
  0x42   : > { %p3210_p3 = pmov %p3208_p2 }
  0x43   : > { %2794 = vsyncadd (%p3209_p7), [#allocation4], 4294934528 }
  0x44   : > { %2796 = dma.done.wait (%p3210_p3), [#allocation6], 32768   ;;  %p3211_p8 = pmov %p3208_p2 }
  0x45   : > { %p327_p9 = scmp.lt.s32.totalorder %s2866_s30, 1  ;;  %v2807_v48 = vmov 0.0|0.0   ;;  %vm2808_vm0 = vmmov 0   ;;  %v2809_v49 = vmov 0.0   ;;  %v412_v50 = vld [vmem:[%s3196_s2] sm:$0x3] }
  0x46   : > { %2798 = vsyncadd (%p3211_p8), [#allocation6], 4294934528  ;;  %2131 = vmatprep.subr.bf16.mxu0 %v2807_v48  ;;  %2120 = vmatprep.mubr.msk.f32.mxu0 %vm2808_vm0, %v2809_v49  ;;  %v2810_v51 = vmov 0   ;;  %vm406_vm1 = vcmask 7168   ;;  %vm418_vm2 = vcmask 261120   ;;  %vm521_vm3 = vcmask 15360  }
  0x47   : > { %s3213_s30 = smov (!%p327_p9, %s2866_s30), 1  ;;  %2697 = vset.pattern.permute.xlu0 %v2810_v51  ;;  %2698 = vset.pattern.permute.xlu1 %v2810_v51  ;;  %vm534_vm4 = vcmask 1041408   ;;  %s2811_s19 = smov 127   ;;  %v1041_v49 = vld [vmem:[#allocation5 + $0x28] sm:$0xff] }
  0x48   : > { %s2092_s10 = sshll.u32 %s3213_s30, 6  ;;  %s1860_s20 = sld [smem:[#allocation2]] }
  0x49   : > { %s331_s18 = scalar_lea.vmem %s3194_s0, %s2092_s10  ;;  %s336_s23 = scalar_lea.vmem %s3202_s8, %s2092_s10 }
  0x4a   : > { %v337_v0 = vld [vmem:[%s331_s18] sm:$0xff]  ;;  %v338_v1 = vld [vmem:[%s331_s18 + $0x8] sm:$0xff]  ;;  %v339_v2 = vld [vmem:[%s331_s18 + $0x10] sm:$0xff] }
  0x4b   : > { %v2952_v3 = vunpack.c.l.bf16 %v337_v0  ;;  %v2954_v4 = vunpack.c.h.bf16 %v337_v0  ;;  %v2956_v5 = vunpack.c.l.bf16 %v338_v1  ;;  %v340_v6 = vld [vmem:[%s331_s18 + $0x18] sm:$0xff]  ;;  %v343_v7 = vld [vmem:[%s331_s18 + $0x30] sm:$0xff]  ;;  %v2958_v9 = vunpack.c.h.bf16 %v338_v1  ;;  %v341_v13 = vld [vmem:[%s331_s18 + $0x20] sm:$0xff] }
  0x4c   : > { %v344_v8 = vld [vmem:[%s331_s18 + $0x38] sm:$0xff]  ;;  %v2960_v10 = vunpack.c.l.bf16 %v339_v2  ;;  %v2962_v11 = vunpack.c.h.bf16 %v339_v2  ;;  %v2964_v12 = vunpack.c.l.bf16 %v340_v6  ;;  %v2970_v16 = vunpack.c.l.bf16 %v343_v7  ;;  %v342_v18 = vld [vmem:[%s331_s18 + $0x28] sm:$0xff] }
  0x4d   : > { %v386_v14 = vmax.f32 %v2952_v3, %v2954_v4  ;;  %v361_v15 = vadd.f32 %v2954_v4, %v2952_v3  ;;  %v2972_v17 = vunpack.c.h.bf16 %v343_v7  ;;  %v2974_v19 = vunpack.c.h.bf16 %v340_v6 }
  0x4e   : > { %v391_v20 = vmax.f32 %v2960_v10, %v2962_v11  ;;  %v366_v21 = vadd.f32 %v2962_v11, %v2960_v10  ;;  %v2980_v22 = vunpack.c.l.bf16 %v344_v8  ;;  %v2986_v26 = vunpack.c.l.bf16 %v341_v13 }
  0x4f   : > { %v387_v23 = vmax.f32 %v386_v14, %v2956_v5  ;;  %v362_v24 = vadd.f32 %v361_v15, %v2956_v5  ;;  %v376_v25 = vadd.f32 %v2972_v17, %v2970_v16  ;;  %v2990_v29 = vunpack.c.h.bf16 %v341_v13  ;;  %v411_v13 = vld [vmem:[%s3195_s1] sm:$0x3] }
  0x50   : > { %v392_v27 = vmax.f32 %v391_v20, %v2964_v12  ;;  %v367_v28 = vadd.f32 %v366_v21, %v2964_v12  ;;  %v2992_v30 = vunpack.c.l.bf16 %v342_v18  ;;  %v2997_v34 = vunpack.c.h.bf16 %v344_v8  ;;  %v493_v14 = vld [vmem:[%s3197_s3] sm:$0xff]  ;;  %v499_v20 = vld [vmem:[%s3198_s4 + $0x10] sm:$0xff]  ;;  %v500_v21 = vld [vmem:[%s3198_s4 + $0x18] sm:$0xff] }
  0x51   : > { %v388_v31 = vmax.f32 %v387_v23, %v2958_v9  ;;  %v363_v32 = vadd.f32 %v362_v24, %v2958_v9  ;;  %v377_v35 = vadd.f32 %v376_v25, %v2980_v22  ;;  %v371_v36 = vadd.f32 %v2990_v29, %v2986_v26  ;;  %2125 = vmatprep.mubr.msk.f32.mxu1 %vm521_vm3, %v493_v14  ;;  %v497_v15 = vld [vmem:[%s3198_s4] sm:$0xff]  ;;  %v1053_v14 = vld [vmem:[#allocation5 + $0x88] sm:$0xff] }
  0x52   : > { %v393_v33 = vmax.f32 %v392_v27, %v2974_v19  ;;  %v368_v37 = vadd.f32 %v367_v28, %v2974_v19  ;;  %v3003_v38 = vunpack.c.h.bf16 %v342_v18  ;;  %v401_v39 = vmax.f32 %v2970_v16, %v2972_v17  ;;  %v498_v18 = vld [vmem:[%s3198_s4 + $0x8] sm:$0xff] }
  0x53   : > { %389 = vmax.xlane.f32.xlu1 %v388_v31  ;;  %364 = vadd.xlane.f32.xlu0 %v363_v32  ;;  %v396_v40 = vmax.f32 %v2986_v26, %v2990_v29  ;;  %v372_v41 = vadd.f32 %v371_v36, %v2992_v30  ;;  %v378_v42 = vadd.f32 %v377_v35, %v2997_v34  ;;  %v494_v31 = vld [vmem:[%s3197_s3 + $0x8] sm:$0xff]  ;;  %v495_v32 = vld [vmem:[%s3197_s3 + $0x10] sm:$0xff] }
  0x54   : > { %v402_v44 = vmax.f32 %v401_v39, %v2980_v22 }
  0x55   : > { %v373_v43 = vadd.f32 %v372_v41, %v3003_v38  ;;  %v397_v45 = vmax.f32 %v396_v40, %v2992_v30 }
  0x56   : > { %v403_v46 = vmax.f32 %v402_v44, %v2997_v34 }
  0x57   : > { %394 = vmax.xlane.f32.xlu1 %v393_v33  ;;  %369 = vadd.xlane.f32.xlu0 %v368_v37  ;;  %v398_v47 = vmax.f32 %v397_v45, %v3003_v38  ;;  %v496_v33 = vld [vmem:[%s3197_s3 + $0x18] sm:$0xff] }
  0x5b   : > { %379 = vadd.xlane.f32.xlu1 %v378_v42  ;;  %374 = vadd.xlane.f32.xlu0 %v373_v43 }
  0x5f   : > { %404 = vmax.xlane.f32.xlu1 %v403_v46  ;;  %399 = vmax.xlane.f32.xlu0 %v398_v47 }
  0x70   : > { %503 = vperm.xlu1 %2698, %v497_v15   ;;  %v1057_v15 = vld [vmem:[#allocation5 + $0xa8] sm:$0xff] }
  0x74   : > { %508 = vperm.xlu1 %2698, %v498_v18  }
  0x75   : > { %415 = vperm.xlu0 %2697, %v412_v50   ;;  %v1039_v50 = vld [vmem:[#allocation5 + $0x18] sm:$0xff] }
  0x78   : > { %513 = vperm.xlu1 %2698, %v499_v20   ;;  %v2145_v20 = vpack.c.bf16 %v1057_v15, %v1053_v14  ;;  %v1078_v14 = vld [vmem:[#allocation5 + $0x150] sm:$0xff] }
  0x7c   : > { %518 = vperm.xlu1 %2698, %v500_v21   ;;  %v1055_v21 = vld [vmem:[#allocation5 + $0x98] sm:$0xff] }
  0xe0   : > { %v390_v52 = vpop.xlane.xlu1 %389  ;;  %v365_v53 = vpop.xlane.xlu0 %364 }
  0xe1   : > { %v382_v54 = vmul.f32 0.001953125, %v365_v53  ;;  %v1036_v53 = vld [vmem:[#allocation5] sm:$0xff] }
  0xe3   : > { %v407_v58 = vsel %vm406_vm1, %v382_v54, %v390_v52  ;;  %v1043_v52 = vld [vmem:[#allocation5 + $0x38] sm:$0xff]  ;;  %v1040_v54 = vld [vmem:[#allocation5 + $0x20] sm:$0xff] }
  0xe4   : > { %v395_v55 = vpop.xlane.xlu1 %394  ;;  %v370_v56 = vpop.xlane.xlu0 %369 }
  0xe5   : > { %v383_v57 = vmul.f32 0.001953125, %v370_v56  ;;  %v2139_v56 = vpack.c.bf16 %v1040_v54, %v1036_v53  ;;  %v1075_v53 = vld [vmem:[#allocation5 + $0x138] sm:$0xff] }
  0xe7   : > { %v408_v59 = vsel %vm406_vm1, %v383_v57, %v395_v55  ;;  %v2265_v55 = vpack.c.bf16 %v1043_v52, %v1039_v50  ;;  %v1038_v57 = vld [vmem:[#allocation5 + $0x10] sm:$0xff]  ;;  %v1069_v50 = vld [vmem:[#allocation5 + $0x108] sm:$0xff]  ;;  %v1071_v52 = vld [vmem:[#allocation5 + $0x118] sm:$0xff] }
  0xe8   : > { %v380_v60 = vpop.xlane.xlu1 %379  ;;  %v375_v61 = vpop.xlane.xlu0 %374  ;;  %v2132_v62 = vpack.c.bf16 %v408_v59, %v407_v58  ;;  %v1042_v58 = vld [vmem:[#allocation5 + $0x30] sm:$0xff]  ;;  %v1045_v59 = vld [vmem:[#allocation5 + $0x48] sm:$0xff] }
  0xe9   : > { %v385_v63 = vmul.f32 0.001953125, %v380_v60  ;;  %v384_v0 = vmul.f32 0.001953125, %v375_v61  ;;  %v2267_v60 = vpack.c.bf16 %v1042_v58, %v1038_v57  ;;  %v1049_v61 = vld [vmem:[#allocation5 + $0x68] sm:$0xff]  ;;  %v1068_v57 = vld [vmem:[#allocation5 + $0x100] sm:$0xff] }
  0xea   : > { %2133 = vmatpush3.bf16.msra.mxu0 %v2132_v62  ;;  %v1047_v62 = vld [vmem:[#allocation5 + $0x58] sm:$0xff]  ;;  %v1072_v58 = vld [vmem:[#allocation5 + $0x120] sm:$0xff] }
  0xeb   : > { %2134 = vmatprep.subr.bf16.mxu0 %v2807_v48  ;;  %v1037_v48 = vld [vmem:[#allocation5 + $0x8] sm:$0xff] }
  0xec   : > { %v405_v1 = vpop.xlane.xlu1 %404  ;;  %v400_v2 = vpop.xlane.xlu0 %399  ;;  %v2137_v51 = vpack.c.bf16 %v1041_v49, %v1037_v48  ;;  %v1062_v48 = vld [vmem:[#allocation5 + $0xd0] sm:$0xff] }
  0xed   : > { %v410_v6 = vsel %vm406_vm1, %v385_v63, %v405_v1  ;;  %v409_v7 = vsel %vm406_vm1, %v384_v0, %v400_v2  ;;  %v1051_v63 = vld [vmem:[#allocation5 + $0x78] sm:$0xff]  ;;  %v2141_v0 = vpack.c.bf16 %v1049_v61, %v1045_v59  ;;  %v1044_v2 = vld [vmem:[#allocation5 + $0x40] sm:$0xff]  ;;  %v1066_v49 = vld [vmem:[#allocation5 + $0xf0] sm:$0xff] }
  0xee   : > { %v2135_v8 = vpack.c.bf16 %v410_v6, %v409_v7  ;;  %v2269_v1 = vpack.c.bf16 %v1051_v63, %v1047_v62  ;;  %v1048_v6 = vld [vmem:[#allocation5 + $0x60] sm:$0xff]  ;;  %v1046_v7 = vld [vmem:[#allocation5 + $0x50] sm:$0xff]  ;;  %v1077_v62 = vld [vmem:[#allocation5 + $0x148] sm:$0xff] }
  0xef   : > { %v1070_v59 = vld [vmem:[#allocation5 + $0x110] sm:$0xff]  ;;  %v1081_v63 = vld [vmem:[#allocation5 + $0x168] sm:$0xff] }
  0xf0   : > { %2136 = vmatpush3.bf16.msra.mxu0 %v2135_v8  ;;  %v504_v35 = vpop.permute.xlu1 %503  ;;  %v2143_v8 = vpack.c.bf16 %v1048_v6, %v1044_v2  ;;  %v1074_v61 = vld [vmem:[#allocation5 + $0x130] sm:$0xff]  ;;  %v2155_v2 = vpack.c.bf16 %v1072_v58, %v1068_v57  ;;  %v1107_v57 = vld [vmem:[#allocation5 + $0x238] sm:$0xff] }
  0xf1   : > { %2266 = vmatprep.subr.bf16.mxu0 %v2265_v55  ;;  %v2279_v55 = vpack.c.bf16 %v1066_v49, %v1062_v48  ;;  %v2283_v6 = vpack.c.bf16 %v1074_v61, %v1070_v59  ;;  %v1092_v49 = vld [vmem:[#allocation5 + $0x1c0] sm:$0xff] }
  0xf2   : > { %v1100_v61 = vld [vmem:[#allocation5 + $0x200] sm:$0xff] }
  0xf3   : > { %2121 = vmatmul.mubr.msk.f32.vlgmr.msra.gmra.mrb[0].mxu0 %vm418_vm2, %v411_v13  ;;  %v1050_v13 = vld [vmem:[#allocation5 + $0x70] sm:$0xff] }
  0xf4   : > { %v416_v23 = vpop.permute.xlu0 %415  ;;  %v509_v36 = vpop.permute.xlu1 %508  ;;  %2268 = vmatpush1.bf16.msra.mxu0 %v2267_v60  ;;  %v2271_v18 = vpack.c.bf16 %v1050_v13, %v1046_v7  ;;  %v2281_v60 = vpack.c.bf16 %v1075_v53, %v1071_v52  ;;  %v2157_v7 = vpack.c.bf16 %v1081_v63, %v1077_v62  ;;  %v1080_v13 = vld [vmem:[#allocation5 + $0x160] sm:$0xff]  ;;  %v1098_v53 = vld [vmem:[#allocation5 + $0x1f0] sm:$0xff] }
  0xf5   : > { %2270 = vmatprep.subr.bf16.mxu0 %v2269_v1  ;;  %v1083_v1 = vld [vmem:[#allocation5 + $0x178] sm:$0xff]  ;;  %v1104_v62 = vld [vmem:[#allocation5 + $0x220] sm:$0xff] }
  0xf8   : > { %v514_v44 = vpop.permute.xlu1 %513  ;;  %2272 = vmatpush1.bf16.msra.mxu0 %v2271_v18  ;;  %v1082_v18 = vld [vmem:[#allocation5 + $0x170] sm:$0xff] }
  0xfc   : > { %v519_v46 = vpop.permute.xlu1 %518 }
 0x1c6   : > { %v488_v24 = vpop.f32.mrb[0].mxu0 }
 0x1c7   : > { %v489_v25 = vadd.f32 %v488_v24, %v416_v23  ;;  %v2122_v27 = vpop.f32.mrb[1].mxu0  ;;  %v1059_v23 = vld [vmem:[#allocation5 + $0xb8] sm:$0xff]  ;;  %v1052_v24 = vld [vmem:[#allocation5 + $0x80] sm:$0xff] }
 0x1c8   : > { %v1056_v27 = vld [vmem:[#allocation5 + $0xa0] sm:$0xff] }
 0x1c9   : > { %v492_v28 = vmax.f32 %v489_v25, 0.0  ;;  %v2273_v25 = vpack.c.bf16 %v1059_v23, %v1055_v21  ;;  %v1089_v21 = vld [vmem:[#allocation5 + $0x1a8] sm:$0xff]  ;;  %v1087_v23 = vld [vmem:[#allocation5 + $0x198] sm:$0xff] }
 0x1cb   : > { %2123 = vmatprep.subr.msk.mxu1 %vm534_vm4, %v492_v28  ;;  %2274 = vmatprep.subr.bf16.mxu0 %v2273_v25 }
 0x1cc   : > { %2124 = vmatpush3.msk.msra.mxu1 %vm534_vm4, %v492_v28  ;;  %v1054_v28 = vld [vmem:[#allocation5 + $0x90] sm:$0xff] }
 0x1cd   : > { %2126 = vmatmul.mubr.msk.f32.vlgmr.msra.gmra.mrb[0].mxu1 %vm521_vm3, %v494_v31  ;;  %2138 = vmatprep.subr.bf16.mxu1 %v2137_v51  ;;  %v1058_v31 = vld [vmem:[#allocation5 + $0xb0] sm:$0xff]  ;;  %v1073_v51 = vld [vmem:[#allocation5 + $0x128] sm:$0xff] }
 0x1ce   : > { %2128 = vmatprep.mubr.msk.f32.mxu1 %vm521_vm3, %v495_v32  ;;  %2140 = vmatpush1.bf16.msra.mxu1 %v2139_v56  ;;  %v2147_v32 = vpack.c.bf16 %v1056_v27, %v1052_v24  ;;  %v2153_v56 = vpack.c.bf16 %v1073_v51, %v1069_v50  ;;  %v1091_v24 = vld [vmem:[#allocation5 + $0x1b8] sm:$0xff]  ;;  %v2287_v27 = vpack.c.bf16 %v1082_v18, %v1078_v14  ;;  %v1096_v50 = vld [vmem:[#allocation5 + $0x1e0] sm:$0xff]  ;;  %v1094_v51 = vld [vmem:[#allocation5 + $0x1d0] sm:$0xff] }
 0x1cf   : > { %2142 = vmatprep.subr.bf16.mxu1 %v2141_v0  ;;  %v1079_v0 = vld [vmem:[#allocation5 + $0x158] sm:$0xff]  ;;  %v2167_v58 = vpack.c.bf16 %v1096_v50, %v1092_v49  ;;  %v2295_v59 = vpack.c.bf16 %v1098_v53, %v1094_v51  ;;  %v1110_v50 = vld [vmem:[#allocation5 + $0x250] sm:$0xff] }
 0x1d0   : > { %v2285_v15 = vpack.c.bf16 %v1083_v1, %v1079_v0  ;;  %v1102_v0 = vld [vmem:[#allocation5 + $0x210] sm:$0xff] }
 0x1d1   : > { %2129 = vmatmul.mubr.msk.f32.gmra.mrb[2].mxu1 %vm521_vm3, %v496_v33  ;;  %v1061_v33 = vld [vmem:[#allocation5 + $0xc8] sm:$0xff]  ;;  %v1106_v1 = vld [vmem:[#allocation5 + $0x230] sm:$0xff] }
 0x1d2   : > { %2144 = vmatpush1.bf16.msra.mxu1 %v2143_v8  ;;  %v1076_v8 = vld [vmem:[#allocation5 + $0x140] sm:$0xff]  ;;  %v1114_v51 = vld [vmem:[#allocation5 + $0x270] sm:$0xff] }
 0x1d3   : > { %2146 = vmatprep.subr.bf16.mxu1 %v2145_v20  ;;  %v1085_v20 = vld [vmem:[#allocation5 + $0x188] sm:$0xff]  ;;  %v2159_v25 = vpack.c.bf16 %v1080_v13, %v1076_v8 }
 0x1d6   : > { %2148 = vmatpush1.bf16.msra.mxu1 %v2147_v32  ;;  %v1088_v32 = vld [vmem:[#allocation5 + $0x1a0] sm:$0xff] }
 0x2a0   : > { %v2127_v37 = vpop.f32.mrb[0].mxu1 }
 0x2a1   : > { %v3050_v39 = vadd.f32 %v2127_v37, %v509_v36  ;;  %v604_v40 = vpop.f32.mrb[1].mxu1  ;;  %v1063_v36 = vld [vmem:[#allocation5 + $0xd8] sm:$0xff]  ;;  %v2275_v37 = vpack.c.bf16 %v1058_v31, %v1054_v28  ;;  %v2161_v28 = vpack.c.bf16 %v1089_v21, %v1085_v20  ;;  %v1084_v31 = vld [vmem:[#allocation5 + $0x180] sm:$0xff] }
 0x2a2   : > { %v3053_v42 = vadd.f32 %v604_v40, %v504_v35  ;;  %v1065_v35 = vld [vmem:[#allocation5 + $0xe8] sm:$0xff] }
 0x2a3   : > { %629 = vrot.lane.b32.xlu1 %v3050_v39, %s2811_s19  ;;  %v2149_v40 = vpack.c.bf16 %v1065_v35, %v1061_v33  ;;  %2276 = vmatpush1.bf16.msra.mxu0 %v2275_v37  ;;  %v1086_v33 = vld [vmem:[#allocation5 + $0x190] sm:$0xff]  ;;  %v2289_v35 = vpack.c.bf16 %v1091_v24, %v1087_v23  ;;  %v1093_v37 = vld [vmem:[#allocation5 + $0x1c8] sm:$0xff] }
 0x2a4   : > { %v2130_v41 = vpop.f32.mrb[2].mxu1 }
 0x2a5   : > { %v614_v43 = vpop.f32.mrb[3].mxu1  ;;  %v3059_v47 = vadd.f32 %v2130_v41, %v519_v46  ;;  %v1067_v41 = vld [vmem:[#allocation5 + $0xf8] sm:$0xff]  ;;  %2150 = vmatprep.subr.bf16.mxu1 %v2149_v40  ;;  %v1097_v40 = vld [vmem:[#allocation5 + $0x1e8] sm:$0xff] }
 0x2a6   : > { %v3056_v45 = vadd.f32 %v614_v43, %v514_v44  ;;  %v1060_v43 = vld [vmem:[#allocation5 + $0xc0] sm:$0xff]  ;;  %v2277_v46 = vpack.c.bf16 %v1067_v41, %v1063_v36  ;;  %v1090_v36 = vld [vmem:[#allocation5 + $0x1b0] sm:$0xff]  ;;  %v1095_v41 = vld [vmem:[#allocation5 + $0x1d8] sm:$0xff]  ;;  %v2165_v48 = vpack.c.bf16 %v1097_v40, %v1093_v37 }
 0x2a7   : > { %627 = vrot.lane.b32.xlu1 %v3053_v42, %s2811_s19  ;;  %v1064_v44 = vld [vmem:[#allocation5 + $0xe0] sm:$0xff]  ;;  %v1113_v40 = vld [vmem:[#allocation5 + $0x268] sm:$0xff] }
 0x2a8   : > { %v2151_v54 = vpack.c.bf16 %v1064_v44, %v1060_v43  ;;  %2278 = vmatprep.subr.bf16.mxu0 %v2277_v46  ;;  %v1099_v43 = vld [vmem:[#allocation5 + $0x1f8] sm:$0xff]  ;;  %v2163_v44 = vpack.c.bf16 %v1088_v32, %v1084_v31  ;;  %v2291_v46 = vpack.c.bf16 %v1090_v36, %v1086_v33 }
 0x2a9   : > { %2280 = vmatpush1.bf16.msra.mxu0 %v2279_v55  ;;  %v2293_v52 = vpack.c.bf16 %v1099_v43, %v1095_v41  ;;  %v1105_v55 = vld [vmem:[#allocation5 + $0x228] sm:$0xff]  ;;  %v1111_v41 = vld [vmem:[#allocation5 + $0x258] sm:$0xff] }
 0x2aa   : > { %2152 = vmatpush1.bf16.msra.mxu1 %v2151_v54  ;;  %2282 = vmatprep.subr.bf16.mxu0 %v2281_v60  ;;  %v1101_v54 = vld [vmem:[#allocation5 + $0x208] sm:$0xff] }
 0x2ab   : > { %631 = vrot.lane.b32.xlu1 %v3056_v45, %s2811_s19  ;;  %2154 = vmatprep.subr.bf16.mxu1 %v2153_v56  ;;  %v1103_v56 = vld [vmem:[#allocation5 + $0x218] sm:$0xff]  ;;  %v2169_v60 = vpack.c.bf16 %v1105_v55, %v1101_v54  ;;  %v1117_v54 = vld [vmem:[#allocation5 + $0x288] sm:$0xff] }
 0x2ac   : > { %v2297_v63 = vpack.c.bf16 %v1107_v57, %v1103_v56  ;;  %v1121_v55 = vld [vmem:[#allocation5 + $0x2a8] sm:$0xff]  ;;  %v1119_v56 = vld [vmem:[#allocation5 + $0x298] sm:$0xff] }
 0x2ad   : > { %2284 = vmatpush1.bf16.msra.mxu0 %v2283_v6  ;;  %v2299_v6 = vpack.c.bf16 %v1106_v1, %v1102_v0  ;;  %v2177_v57 = vpack.c.bf16 %v1121_v55, %v1117_v54  ;;  %v1122_v0 = vld [vmem:[#allocation5 + $0x2b0] sm:$0xff] }
 0x2ae   : > { %2156 = vmatpush1.bf16.msra.mxu1 %v2155_v2  ;;  %2286 = vmatprep.subr.bf16.mxu0 %v2285_v15  ;;  %v2171_v2 = vpack.c.bf16 %v1104_v62, %v1100_v61  ;;  %v1146_v54 = vld [vmem:[#allocation5 + $0x370] sm:$0xff] }
 0x2af   : > { %633 = vrot.lane.b32.xlu1 %v3059_v47, %s2811_s19  ;;  %2158 = vmatprep.subr.bf16.mxu1 %v2157_v7 }
 0x2b1   : > { %2288 = vmatpush1.bf16.msra.mxu0 %v2287_v27 }
 0x2b2   : > { %2160 = vmatpush1.bf16.msra.mxu1 %v2159_v25  ;;  %2290 = vmatprep.subr.bf16.mxu0 %v2289_v35 }
 0x2b3   : > { %2162 = vmatprep.subr.bf16.mxu1 %v2161_v28 }
 0x2b5   : > { %2292 = vmatpush1.bf16.msra.mxu0 %v2291_v46  ;;  %v1112_v46 = vld [vmem:[#allocation5 + $0x260] sm:$0xff] }
 0x2b6   : > { %2164 = vmatpush1.bf16.msra.mxu1 %v2163_v44  ;;  %2294 = vmatprep.subr.bf16.mxu0 %v2293_v52  ;;  %v1108_v44 = vld [vmem:[#allocation5 + $0x240] sm:$0xff]  ;;  %v2303_v52 = vpack.c.bf16 %v1114_v51, %v1110_v50 }
 0x2b7   : > { %2166 = vmatprep.subr.bf16.mxu1 %v2165_v48  ;;  %v2175_v49 = vpack.c.bf16 %v1112_v46, %v1108_v44  ;;  %v1143_v44 = vld [vmem:[#allocation5 + $0x358] sm:$0xff]  ;;  %v1144_v50 = vld [vmem:[#allocation5 + $0x360] sm:$0xff] }
 0x2b9   : > { %2296 = vmatpush1.bf16.msra.mxu0 %v2295_v59  ;;  %v1116_v59 = vld [vmem:[#allocation5 + $0x280] sm:$0xff] }
 0x2ba   : > { %2168 = vmatpush1.bf16.msra.mxu1 %v2167_v58  ;;  %2298 = vmatprep.subr.bf16.mxu0 %v2297_v63  ;;  %v1123_v58 = vld [vmem:[#allocation5 + $0x2b8] sm:$0xff]  ;;  %v1118_v63 = vld [vmem:[#allocation5 + $0x290] sm:$0xff] }
 0x2bb   : > { %2170 = vmatprep.subr.bf16.mxu1 %v2169_v60  ;;  %v1120_v60 = vld [vmem:[#allocation5 + $0x2a0] sm:$0xff]  ;;  %v2305_v61 = vpack.c.bf16 %v1123_v58, %v1119_v56  ;;  %v2307_v1 = vpack.c.bf16 %v1122_v0, %v1118_v63  ;;  %v1149_v56 = vld [vmem:[#allocation5 + $0x388] sm:$0xff]  ;;  %v1151_v58 = vld [vmem:[#allocation5 + $0x398] sm:$0xff] }
 0x2bc   : > { %v2179_v62 = vpack.c.bf16 %v1120_v60, %v1116_v59  ;;  %v1155_v60 = vld [vmem:[#allocation5 + $0x3b8] sm:$0xff] }
 0x2bd   : > { %2300 = vmatpush1.bf16.msra.mxu0 %v2299_v6  ;;  %v1125_v6 = vld [vmem:[#allocation5 + $0x2c8] sm:$0xff]  ;;  %v2321_v63 = vpack.c.bf16 %v1155_v60, %v1151_v58 }
 0x2be   : > { %2172 = vmatpush1.bf16.msra.mxu1 %v2171_v2 }
 0x315   : > { %v630_v7 = vpop.permute.xlu1 %629 }
 0x316   : > { %v640_v8 = vadd.f32 %v630_v7, %v3050_v39  ;;  %v1129_v7 = vld [vmem:[#allocation5 + $0x2e8] sm:$0xff] }
 0x318   : > { %v2075_v13 = vmul.f32 -1.442695, %v640_v8  ;;  %v1127_v8 = vld [vmem:[#allocation5 + $0x2d8] sm:$0xff] }
 0x319   : > { %v628_v14 = vpop.permute.xlu1 %627 }
 0x31a   : > { %2699 = vpow2.f32 %v2075_v13  ;;  %v639_v15 = vadd.f32 %v628_v14, %v3053_v42  ;;  %v2181_v13 = vpack.c.bf16 %v1129_v7, %v1125_v6  ;;  %v1131_v14 = vld [vmem:[#allocation5 + $0x2f8] sm:$0xff]  ;;  %v1157_v7 = vld [vmem:[#allocation5 + $0x3c8] sm:$0xff] }
 0x31c   : > { %v2074_v18 = vmul.f32 -1.442695, %v639_v15  ;;  %v1124_v15 = vld [vmem:[#allocation5 + $0x2c0] sm:$0xff] }
 0x31d   : > { %v632_v20 = vpop.permute.xlu1 %631 }
 0x31e   : > { %2701 = vpow2.f32 %v2074_v18  ;;  %v641_v21 = vadd.f32 %v632_v20, %v3056_v45  ;;  %v1109_v45 = vld [vmem:[#allocation5 + $0x248] sm:$0xff]  ;;  %v1128_v18 = vld [vmem:[#allocation5 + $0x2e0] sm:$0xff]  ;;  %v2309_v20 = vpack.c.bf16 %v1131_v14, %v1127_v8 }
 0x31f   : > { %v2173_v43 = vpack.c.bf16 %v1113_v40, %v1109_v45  ;;  %v1134_v45 = vld [vmem:[#allocation5 + $0x310] sm:$0xff]  ;;  %v1161_v8 = vld [vmem:[#allocation5 + $0x3e8] sm:$0xff] }
 0x320   : > { %v2076_v23 = vmul.f32 -1.442695, %v641_v21  ;;  %v2183_v21 = vpack.c.bf16 %v1128_v18, %v1124_v15  ;;  %v1138_v40 = vld [vmem:[#allocation5 + $0x330] sm:$0xff]  ;;  %v2197_v14 = vpack.c.bf16 %v1161_v8, %v1157_v7  ;;  %v1163_v15 = vld [vmem:[#allocation5 + $0x3f8] sm:$0xff]  ;;  %v1156_v18 = vld [vmem:[#allocation5 + $0x3c0] sm:$0xff] }
 0x321   : > { %v634_v24 = vpop.permute.xlu1 %633  ;;  %2174 = vmatprep.subr.bf16.mxu1 %v2173_v43  ;;  %v1141_v43 = vld [vmem:[#allocation5 + $0x348] sm:$0xff]  ;;  %v1166_v7 = vld [vmem:[#allocation5 + $0x410] sm:$0xff] }
 0x322   : > { %2703 = vpow2.f32 %v2076_v23  ;;  %v642_v25 = vadd.f32 %v634_v24, %v3059_v47  ;;  %v1115_v47 = vld [vmem:[#allocation5 + $0x278] sm:$0xff]  ;;  %2176 = vmatpush1.bf16.msra.mxu1 %v2175_v49  ;;  %v1126_v23 = vld [vmem:[#allocation5 + $0x2d0] sm:$0xff]  ;;  %v1140_v49 = vld [vmem:[#allocation5 + $0x340] sm:$0xff] }
 0x323   : > { %v2301_v48 = vpack.c.bf16 %v1115_v47, %v1111_v41  ;;  %2178 = vmatprep.subr.bf16.mxu1 %v2177_v57  ;;  %v1130_v24 = vld [vmem:[#allocation5 + $0x2f0] sm:$0xff]  ;;  %v2315_v41 = vpack.c.bf16 %v1138_v40, %v1134_v45  ;;  %v1145_v47 = vld [vmem:[#allocation5 + $0x368] sm:$0xff] }
 0x324   : > { %v2700_v27 = vpop.eup %2699  ;;  %v2077_v28 = vmul.f32 -1.442695, %v642_v25  ;;  %v2189_v46 = vpack.c.bf16 %v1145_v47, %v1141_v43  ;;  %v1153_v57 = vld [vmem:[#allocation5 + $0x3a8] sm:$0xff]  ;;  %v1170_v8 = vld [vmem:[#allocation5 + $0x430] sm:$0xff] }
 0x325   : > { %v656_v31 = vadd.f32 1.0, %v2700_v27  ;;  %2302 = vmatprep.subr.bf16.mxu0 %v2301_v48  ;;  %v2311_v27 = vpack.c.bf16 %v1130_v24, %v1126_v23  ;;  %v1147_v48 = vld [vmem:[#allocation5 + $0x378] sm:$0xff]  ;;  %v2193_v59 = vpack.c.bf16 %v1153_v57, %v1149_v56  ;;  %v1158_v24 = vld [vmem:[#allocation5 + $0x3d0] sm:$0xff] }
 0x326   : > { %2705 = vpow2.f32 %v2077_v28  ;;  %2304 = vmatpush1.bf16.msra.mxu0 %v2303_v52  ;;  %2180 = vmatpush1.bf16.msra.mxu1 %v2179_v62  ;;  %v1133_v28 = vld [vmem:[#allocation5 + $0x308] sm:$0xff]  ;;  %v2317_v51 = vpack.c.bf16 %v1147_v48, %v1143_v44  ;;  %v2191_v52 = vpack.c.bf16 %v1144_v50, %v1140_v49  ;;  %v1152_v62 = vld [vmem:[#allocation5 + $0x3a0] sm:$0xff] }
 0x327   : > { %2707 = vrcp.f32 %v656_v31  ;;  %2306 = vmatprep.subr.bf16.mxu0 %v2305_v61  ;;  %2182 = vmatprep.subr.bf16.mxu1 %v2181_v13  ;;  %v1137_v31 = vld [vmem:[#allocation5 + $0x328] sm:$0xff]  ;;  %v1148_v61 = vld [vmem:[#allocation5 + $0x380] sm:$0xff]  ;;  %v1159_v13 = vld [vmem:[#allocation5 + $0x3d8] sm:$0xff] }
 0x328   : > { %v2702_v39 = vpop.eup %2701  ;;  %v2195_v0 = vpack.c.bf16 %v1152_v62, %v1148_v61 }
 0x329   : > { %v655_v32 = vadd.f32 1.0, %v2702_v39  ;;  %v1135_v39 = vld [vmem:[#allocation5 + $0x318] sm:$0xff] }
 0x32a   : > { %2308 = vmatpush1.bf16.msra.mxu0 %v2307_v1  ;;  %2184 = vmatpush1.bf16.msra.mxu1 %v2183_v21  ;;  %v1150_v1 = vld [vmem:[#allocation5 + $0x390] sm:$0xff]  ;;  %v2325_v21 = vpack.c.bf16 %v1163_v15, %v1159_v13  ;;  %v1173_v15 = vld [vmem:[#allocation5 + $0x448] sm:$0xff] }
 0x32b   : > { %2709 = vrcp.f32 %v655_v32  ;;  %2310 = vmatprep.subr.bf16.mxu0 %v2309_v20  ;;  %v2185_v32 = vpack.c.bf16 %v1137_v31, %v1133_v28  ;;  %v1160_v20 = vld [vmem:[#allocation5 + $0x3e0] sm:$0xff]  ;;  %v1165_v28 = vld [vmem:[#allocation5 + $0x408] sm:$0xff] }
 0x32c   : > { %v2704_v33 = vpop.eup %2703  ;;  %v2199_v23 = vpack.c.bf16 %v1160_v20, %v1156_v18  ;;  %v1169_v31 = vld [vmem:[#allocation5 + $0x428] sm:$0xff] }
 0x32d   : > { %v657_v42 = vadd.f32 1.0, %v2704_v33  ;;  %v1139_v33 = vld [vmem:[#allocation5 + $0x338] sm:$0xff]  ;;  %2186 = vmatprep.subr.bf16.mxu1 %v2185_v32  ;;  %v2201_v32 = vpack.c.bf16 %v1169_v31, %v1165_v28  ;;  %v1177_v20 = vld [vmem:[#allocation5 + $0x468] sm:$0xff]  ;;  %v2331_v28 = vpack.c.bf16 %v1170_v8, %v1166_v7  ;;  %v1172_v31 = vld [vmem:[#allocation5 + $0x440] sm:$0xff] }
 0x32e   : > { %2312 = vmatpush1.bf16.msra.mxu0 %v2311_v27  ;;  %v1197_v7 = vld [vmem:[#allocation5 + $0x508] sm:$0xff] }
 0x32f   : > { %2711 = vrcp.f32 %v657_v42  ;;  %v1132_v42 = vld [vmem:[#allocation5 + $0x300] sm:$0xff]  ;;  %v1201_v8 = vld [vmem:[#allocation5 + $0x528] sm:$0xff] }
 0x330   : > { %v2706_v35 = vpop.eup %2705 }
 0x331   : > { %v2708_v36 = vpop.eup %2707  ;;  %v658_v37 = vadd.f32 1.0, %v2706_v35  ;;  %v1136_v35 = vld [vmem:[#allocation5 + $0x320] sm:$0xff] }
 0x332   : > { %674 = vperm.xlu1 %2698, %v2708_v36   ;;  %v2313_v36 = vpack.c.bf16 %v1139_v33, %v1135_v39  ;;  %v1167_v39 = vld [vmem:[#allocation5 + $0x418] sm:$0xff] }
 0x333   : > { %2713 = vrcp.f32 %v658_v37  ;;  %v2187_v37 = vpack.c.bf16 %v1136_v35, %v1132_v42  ;;  %v1171_v33 = vld [vmem:[#allocation5 + $0x438] sm:$0xff] }
 0x334   : > { %2314 = vmatprep.subr.bf16.mxu0 %v2313_v36  ;;  %v2329_v42 = vpack.c.bf16 %v1171_v33, %v1167_v39  ;;  %v1176_v39 = vld [vmem:[#allocation5 + $0x460] sm:$0xff]  ;;  %v1178_v33 = vld [vmem:[#allocation5 + $0x470] sm:$0xff] }
 0x335   : > { %v2710_v53 = vpop.eup %2709  ;;  %2188 = vmatpush1.bf16.msra.mxu1 %v2187_v37  ;;  %2316 = vmatpush1.bf16.msra.mxu0 %v2315_v41 }
 0x336   : > { %669 = vperm.xlu0 %2697, %v2710_v53   ;;  %v1142_v53 = vld [vmem:[#allocation5 + $0x350] sm:$0xff]  ;;  %2190 = vmatprep.subr.bf16.mxu1 %v2189_v46 }
 0x337   : > { %v2319_v55 = vpack.c.bf16 %v1146_v54, %v1142_v53  ;;  %2318 = vmatprep.subr.bf16.mxu0 %v2317_v51 }
 0x339   : > { %v2712_v2 = vpop.eup %2711  ;;  %2192 = vmatpush1.bf16.msra.mxu1 %v2191_v52  ;;  %2320 = vmatpush1.bf16.msra.mxu0 %v2319_v55 }
 0x33a   : > { %679 = vperm.xlu0 %2697, %v2712_v2   ;;  %v1154_v2 = vld [vmem:[#allocation5 + $0x3b0] sm:$0xff]  ;;  %2194 = vmatprep.subr.bf16.mxu1 %v2193_v59 }
 0x33b   : > { %v2323_v6 = vpack.c.bf16 %v1154_v2, %v1150_v1  ;;  %2322 = vmatprep.subr.bf16.mxu0 %v2321_v63  ;;  %v1164_v1 = vld [vmem:[#allocation5 + $0x400] sm:$0xff] }
 0x33d   : > { %v2714_v25 = vpop.eup %2713  ;;  %2196 = vmatpush1.bf16.msra.mxu1 %v2195_v0  ;;  %2324 = vmatpush1.bf16.msra.mxu0 %v2323_v6  ;;  %v1168_v6 = vld [vmem:[#allocation5 + $0x420] sm:$0xff] }
 0x33e   : > { %684 = vperm.xlu1 %2698, %v2714_v25   ;;  %v1162_v25 = vld [vmem:[#allocation5 + $0x3f0] sm:$0xff]  ;;  %2198 = vmatprep.subr.bf16.mxu1 %v2197_v14 }
 0x33f   : > { %v2327_v27 = vpack.c.bf16 %v1162_v25, %v1158_v24  ;;  %2326 = vmatprep.subr.bf16.mxu0 %v2325_v21  ;;  %v1175_v21 = vld [vmem:[#allocation5 + $0x458] sm:$0xff] }
 0x341   : > { %2200 = vmatpush1.bf16.msra.mxu1 %v2199_v23  ;;  %2328 = vmatpush1.bf16.msra.mxu0 %v2327_v27  ;;  %v1179_v23 = vld [vmem:[#allocation5 + $0x478] sm:$0xff]  ;;  %v2203_v27 = vpack.c.bf16 %v1168_v6, %v1164_v1  ;;  %v1194_v6 = vld [vmem:[#allocation5 + $0x4f0] sm:$0xff] }
 0x342   : > { %2202 = vmatprep.subr.bf16.mxu1 %v2201_v32  ;;  %2330 = vmatprep.subr.bf16.mxu0 %v2329_v42  ;;  %v1174_v32 = vld [vmem:[#allocation5 + $0x450] sm:$0xff]  ;;  %v1181_v42 = vld [vmem:[#allocation5 + $0x488] sm:$0xff] }
 0x3b1   : > { %v3068_v36 = vpop.permute.xlu1 %674 }
 0x3b2   : > { %v3086_v43 = vmul.f32 %v3068_v36, %v2960_v10  ;;  %v3090_v47 = vmul.f32 %v3068_v36, %v2962_v11 }
 0x3b5   : > { %v3066_v35 = vpop.permute.xlu0 %669 }
 0x3b6   : > { %v3072_v37 = vmul.f32 %v3066_v35, %v2952_v3  ;;  %v3076_v45 = vmul.f32 %v3066_v35, %v2954_v4  ;;  %v3080_v40 = vmul.f32 %v3066_v35, %v2958_v9  ;;  %v3094_v3 = vmul.f32 %v3068_v36, %v2974_v19 }
 0x3b8   : > { %v739_v11 = vadd.f32 %v3086_v43, %v3072_v37  ;;  %v748_v44 = vadd.f32 %v3090_v47, %v3076_v45  ;;  %v766_v19 = vadd.f32 %v3094_v3, %v3080_v40 }
 0x3b9   : > { %v3082_v41 = vpop.permute.xlu0 %679 }
 0x3ba   : > { %v3098_v4 = vmul.f32 %v3082_v41, %v2986_v26  ;;  %v3102_v9 = vmul.f32 %v3082_v41, %v2990_v29  ;;  %v3106_v10 = vmul.f32 %v3082_v41, %v3003_v38 }
 0x3bc   : > { %v740_v48 = vadd.f32 %v739_v11, %v3098_v4  ;;  %v749_v49 = vadd.f32 %v748_v44, %v3102_v9  ;;  %v767_v50 = vadd.f32 %v766_v19, %v3106_v10  ;;  %v2205_v11 = vpack.c.bf16 %v1177_v20, %v1173_v15  ;;  %v1185_v19 = vld [vmem:[#allocation5 + $0x4a8] sm:$0xff]  ;;  %v1196_v20 = vld [vmem:[#allocation5 + $0x500] sm:$0xff] }
 0x3bd   : > { %v3114_v46 = vpop.permute.xlu1 %684  ;;  %v2333_v44 = vpack.c.bf16 %v1179_v23, %v1175_v21  ;;  %v1200_v21 = vld [vmem:[#allocation5 + $0x520] sm:$0xff]  ;;  %v2217_v23 = vpack.c.bf16 %v1201_v8, %v1197_v7 }
 0x3be   : > { %v3118_v26 = vmul.f32 %v3114_v46, %v2970_v16  ;;  %v3122_v29 = vmul.f32 %v3114_v46, %v2972_v17  ;;  %v3126_v38 = vmul.f32 %v3114_v46, %v2997_v34 }
 0x3c0   : > { %v741_v51 = vadd.f32 %v740_v48, %v3118_v26  ;;  %v750_v52 = vadd.f32 %v749_v49, %v3122_v29  ;;  %v768_v16 = vadd.f32 %v767_v50, %v3126_v38  ;;  %v1183_v48 = vld [vmem:[#allocation5 + $0x498] sm:$0xff] }
 0x3c1   : > { %v1187_v49 = vld [vmem:[#allocation5 + $0x4b8] sm:$0xff] }
 0x3c2   : > { %v742_v53 = vrot.slane %v741_v51, 4  ;;  %v751_v54 = vrot.slane %v750_v52, 4  ;;  %v769_v17 = vrot.slane %v768_v16, 4 }
 0x3c4   : > { %v743_v55 = vadd.f32 %v742_v53, %v741_v51  ;;  %v752_v56 = vadd.f32 %v751_v54, %v750_v52  ;;  %v770_v57 = vadd.f32 %v769_v17, %v768_v16  ;;  %v2207_v51 = vpack.c.bf16 %v1176_v39, %v1172_v31  ;;  %v1180_v16 = vld [vmem:[#allocation5 + $0x480] sm:$0xff]  ;;  %v1209_v31 = vld [vmem:[#allocation5 + $0x568] sm:$0xff]  ;;  %v1207_v39 = vld [vmem:[#allocation5 + $0x558] sm:$0xff] }
 0x3c5   : > { %v2335_v52 = vpack.c.bf16 %v1178_v33, %v1174_v32  ;;  %v1184_v53 = vld [vmem:[#allocation5 + $0x4a0] sm:$0xff]  ;;  %v2209_v54 = vpack.c.bf16 %v1185_v19, %v1181_v42  ;;  %v2337_v17 = vpack.c.bf16 %v1187_v49, %v1183_v48  ;;  %v1211_v32 = vld [vmem:[#allocation5 + $0x578] sm:$0xff]  ;;  %v2219_v33 = vpack.c.bf16 %v1200_v21, %v1196_v20  ;;  %v1206_v49 = vld [vmem:[#allocation5 + $0x550] sm:$0xff] }
 0x3c6   : > { %v744_v34 = vrot.slane %v743_v55, 2  ;;  %v753_v58 = vrot.slane %v752_v56, 2  ;;  %v771_v59 = vrot.slane %v770_v57, 2  ;;  %v2349_v48 = vpack.c.bf16 %v1211_v32, %v1207_v39  ;;  %v1231_v20 = vld [vmem:[#allocation5 + $0x618] sm:$0xff] }
 0x3c7   : > { %v1235_v21 = vld [vmem:[#allocation5 + $0x638] sm:$0xff] }
 0x3c8   : > { %v745_v60 = vadd.f32 %v744_v34, %v743_v55  ;;  %v754_v61 = vadd.f32 %v753_v58, %v752_v56  ;;  %v772_v62 = vadd.f32 %v771_v59, %v770_v57  ;;  %v1182_v55 = vld [vmem:[#allocation5 + $0x490] sm:$0xff]  ;;  %v1189_v57 = vld [vmem:[#allocation5 + $0x4c8] sm:$0xff]  ;;  %v1191_v58 = vld [vmem:[#allocation5 + $0x4d8] sm:$0xff]  ;;  %v2361_v32 = vpack.c.bf16 %v1235_v21, %v1231_v20 }
 0x3c9   : > { %v1186_v56 = vld [vmem:[#allocation5 + $0x4b0] sm:$0xff]  ;;  %v1193_v34 = vld [vmem:[#allocation5 + $0x4e8] sm:$0xff]  ;;  %v1195_v59 = vld [vmem:[#allocation5 + $0x4f8] sm:$0xff] }
 0x3ca   : > { %v746_v63 = vrot.slane %v745_v60, 1  ;;  %v755_v0 = vrot.slane %v754_v61, 1  ;;  %v773_v2 = vrot.slane %v772_v62, 1  ;;  %v2341_v1 = vpack.c.bf16 %v1195_v59, %v1191_v58  ;;  %v1214_v58 = vld [vmem:[#allocation5 + $0x590] sm:$0xff] }
 0x3cb   : > { %v1218_v59 = vld [vmem:[#allocation5 + $0x5b0] sm:$0xff] }
 0x3cc   : > { %v756_v13 = vadd.f32 %v755_v0, %v754_v61  ;;  %v747_v14 = vadd.f32 %v746_v63, %v745_v60  ;;  %v774_v18 = vadd.f32 %v773_v2, %v772_v62  ;;  %v2211_v60 = vpack.c.bf16 %v1184_v53, %v1180_v16  ;;  %v1188_v62 = vld [vmem:[#allocation5 + $0x4c0] sm:$0xff]  ;;  %v1190_v2 = vld [vmem:[#allocation5 + $0x4d0] sm:$0xff]  ;;  %v1215_v16 = vld [vmem:[#allocation5 + $0x598] sm:$0xff] }
 0x3cd   : > { %v2339_v61 = vpack.c.bf16 %v1186_v56, %v1182_v55  ;;  %v1192_v63 = vld [vmem:[#allocation5 + $0x4e0] sm:$0xff]  ;;  %v2213_v0 = vpack.c.bf16 %v1193_v34, %v1189_v57  ;;  %v1219_v53 = vld [vmem:[#allocation5 + $0x5b8] sm:$0xff] }
 0x3ce   : > { %v777_v24 = vmul.f32 0.03125, %v756_v13  ;;  %v776_v25 = vmul.f32 0.03125, %v747_v14  ;;  %v779_v50 = vmul.f32 0.03125, %v774_v18  ;;  %v1199_v13 = vld [vmem:[#allocation5 + $0x518] sm:$0xff]  ;;  %v2215_v15 = vpack.c.bf16 %v1192_v63, %v1188_v62  ;;  %v1212_v55 = vld [vmem:[#allocation5 + $0x580] sm:$0xff] }
 0x3cf   : > { %v1203_v14 = vld [vmem:[#allocation5 + $0x538] sm:$0xff]  ;;  %v2343_v18 = vpack.c.bf16 %v1194_v6, %v1190_v2  ;;  %v1216_v56 = vld [vmem:[#allocation5 + $0x5a0] sm:$0xff]  ;;  %v2353_v34 = vpack.c.bf16 %v1219_v53, %v1215_v16  ;;  %v3150_v53 = vmul.f32 %v3114_v46, %v2980_v22 }
 0x3d0   : > { %1356 = vmatprep.mubr.f32.mxu1 %v777_v24  ;;  %1498 = vmatprep.mubr.f32.mxu0 %v777_v24  ;;  %v2345_v24 = vpack.c.bf16 %v1203_v14, %v1199_v13  ;;  %v1223_v62 = vld [vmem:[#allocation5 + $0x5d8] sm:$0xff]  ;;  %v1220_v2 = vld [vmem:[#allocation5 + $0x5c0] sm:$0xff]  ;;  %v1222_v13 = vld [vmem:[#allocation5 + $0x5d0] sm:$0xff] }
 0x3d1   : > { %1357 = vmatmul.mubr.f32.vlgmr.msra.gmra.mrb[4].mxu1 %v776_v25  ;;  %1499 = vmatmul.mubr.f32.vlgmr.msra.gmra.mrb[2].mxu0 %v776_v25  ;;  %v1198_v25 = vld [vmem:[#allocation5 + $0x510] sm:$0xff]  ;;  %v1227_v63 = vld [vmem:[#allocation5 + $0x5f8] sm:$0xff]  ;;  %v1224_v6 = vld [vmem:[#allocation5 + $0x5e0] sm:$0xff] }
 0x3d2   : > { %2204 = vmatpush1.bf16.msra.mxu1 %v2203_v27  ;;  %2332 = vmatpush1.bf16.msra.mxu0 %v2331_v28  ;;  %v1202_v27 = vld [vmem:[#allocation5 + $0x530] sm:$0xff]  ;;  %v1205_v28 = vld [vmem:[#allocation5 + $0x548] sm:$0xff]  ;;  %v2357_v8 = vpack.c.bf16 %v1227_v63, %v1223_v62 }
 0x3d3   : > { %1427 = vmatprep.mubr.f32.mxu1 %v779_v50  ;;  %1569 = vmatprep.mubr.f32.mxu0 %v779_v50  ;;  %v2347_v42 = vpack.c.bf16 %v1202_v27, %v1198_v25  ;;  %v2221_v19 = vpack.c.bf16 %v1209_v31, %v1205_v28  ;;  %v1210_v50 = vld [vmem:[#allocation5 + $0x570] sm:$0xff]  ;;  %v1228_v25 = vld [vmem:[#allocation5 + $0x600] sm:$0xff]  ;;  %v3136_v31 = vmul.f32 %v3066_v35, %v2956_v5  ;;  %v1253_v63 = vld [vmem:[#allocation5 + $0x6c8] sm:$0xff] }
 0x3d4   : > { %2206 = vmatprep.subr.bf16.mxu1 %v2205_v11  ;;  %2334 = vmatprep.subr.bf16.mxu0 %v2333_v44  ;;  %v1204_v11 = vld [vmem:[#allocation5 + $0x540] sm:$0xff]  ;;  %v1226_v14 = vld [vmem:[#allocation5 + $0x5f0] sm:$0xff] }
 0x3d5   : > { %v1208_v44 = vld [vmem:[#allocation5 + $0x560] sm:$0xff]  ;;  %v1230_v28 = vld [vmem:[#allocation5 + $0x610] sm:$0xff] }
 0x3d6   : > { %2208 = vmatpush1.bf16.msra.mxu1 %v2207_v51  ;;  %2336 = vmatpush1.bf16.msra.mxu0 %v2335_v52  ;;  %v1213_v51 = vld [vmem:[#allocation5 + $0x588] sm:$0xff]  ;;  %v1232_v27 = vld [vmem:[#allocation5 + $0x620] sm:$0xff]  ;;  %v1250_v62 = vld [vmem:[#allocation5 + $0x6b0] sm:$0xff] }
 0x3d7   : > { %2210 = vmatprep.subr.bf16.mxu1 %v2209_v54  ;;  %2338 = vmatprep.subr.bf16.mxu0 %v2337_v17  ;;  %v1217_v52 = vld [vmem:[#allocation5 + $0x5a8] sm:$0xff]  ;;  %v2223_v54 = vpack.c.bf16 %v1208_v44, %v1204_v11  ;;  %v2351_v17 = vpack.c.bf16 %v1210_v50, %v1206_v49  ;;  %v1239_v44 = vld [vmem:[#allocation5 + $0x658] sm:$0xff]  ;;  %v3144_v49 = vmul.f32 %v3082_v41, %v2992_v30  ;;  %v1242_v30 = vld [vmem:[#allocation5 + $0x670] sm:$0xff] }
 0x3d8   : > { %v2225_v57 = vpack.c.bf16 %v1217_v52, %v1213_v51  ;;  %v1241_v11 = vld [vmem:[#allocation5 + $0x668] sm:$0xff]  ;;  %v2235_v5 = vpack.c.bf16 %v1232_v27, %v1228_v25  ;;  %v1236_v51 = vld [vmem:[#allocation5 + $0x640] sm:$0xff] }
 0x3d9   : > { %v1240_v52 = vld [vmem:[#allocation5 + $0x660] sm:$0xff]  ;;  %v1245_v41 = vld [vmem:[#allocation5 + $0x688] sm:$0xff] }
 0x3da   : > { %2212 = vmatpush1.bf16.msra.mxu1 %v2211_v60  ;;  %2340 = vmatpush1.bf16.msra.mxu0 %v2339_v61  ;;  %v1221_v60 = vld [vmem:[#allocation5 + $0x5c8] sm:$0xff] }
 0x3db   : > { %2214 = vmatprep.subr.bf16.mxu1 %v2213_v0  ;;  %2342 = vmatprep.subr.bf16.mxu0 %v2341_v1  ;;  %v1225_v61 = vld [vmem:[#allocation5 + $0x5e8] sm:$0xff]  ;;  %v2227_v0 = vpack.c.bf16 %v1216_v56, %v1212_v55  ;;  %v2355_v1 = vpack.c.bf16 %v1218_v59, %v1214_v58  ;;  %v1251_v55 = vld [vmem:[#allocation5 + $0x6b8] sm:$0xff]  ;;  %v1244_v58 = vld [vmem:[#allocation5 + $0x680] sm:$0xff] }
 0x3dc   : > { %v2229_v7 = vpack.c.bf16 %v1225_v61, %v1221_v60  ;;  %v1248_v59 = vld [vmem:[#allocation5 + $0x6a0] sm:$0xff]  ;;  %v1246_v61 = vld [vmem:[#allocation5 + $0x690] sm:$0xff]  ;;  %v1261_v25 = vld [vmem:[#allocation5 + $0x708] sm:$0xff] }
 0x3de   : > { %2216 = vmatpush1.bf16.msra.mxu1 %v2215_v15  ;;  %2344 = vmatpush1.bf16.msra.mxu0 %v2343_v18  ;;  %v1229_v15 = vld [vmem:[#allocation5 + $0x608] sm:$0xff] }
 0x3df   : > { %2218 = vmatprep.subr.bf16.mxu1 %v2217_v23  ;;  %2346 = vmatprep.subr.bf16.mxu0 %v2345_v24  ;;  %v1233_v18 = vld [vmem:[#allocation5 + $0x628] sm:$0xff]  ;;  %v2231_v23 = vpack.c.bf16 %v1224_v6, %v1220_v2  ;;  %v2359_v24 = vpack.c.bf16 %v1226_v14, %v1222_v13  ;;  %v1255_v2 = vld [vmem:[#allocation5 + $0x6d8] sm:$0xff]  ;;  %v2371_v13 = vpack.c.bf16 %v1250_v62, %v1246_v61  ;;  %v1252_v14 = vld [vmem:[#allocation5 + $0x6c0] sm:$0xff] }
 0x3e0   : > { %v2233_v39 = vpack.c.bf16 %v1233_v18, %v1229_v15  ;;  %v1259_v6 = vld [vmem:[#allocation5 + $0x6f8] sm:$0xff]  ;;  %v1256_v15 = vld [vmem:[#allocation5 + $0x6e0] sm:$0xff] }
 0x3e1   : > { %v2373_v21 = vpack.c.bf16 %v1259_v6, %v1255_v2  ;;  %v1283_v61 = vld [vmem:[#allocation5 + $0x7b8] sm:$0xff]  ;;  %v1280_v2 = vld [vmem:[#allocation5 + $0x7a0] sm:$0xff] }
 0x3e2   : > { %2220 = vmatpush1.bf16.msra.mxu1 %v2219_v33  ;;  %2348 = vmatpush1.bf16.msra.mxu0 %v2347_v42  ;;  %v1234_v33 = vld [vmem:[#allocation5 + $0x630] sm:$0xff]  ;;  %v1237_v42 = vld [vmem:[#allocation5 + $0x648] sm:$0xff] }
 0x3e3   : > { %2222 = vmatprep.subr.bf16.mxu1 %v2221_v19  ;;  %2350 = vmatprep.subr.bf16.mxu0 %v2349_v48  ;;  %v1243_v19 = vld [vmem:[#allocation5 + $0x678] sm:$0xff]  ;;  %v3140_v48 = vmul.f32 %v3068_v36, %v2964_v12  ;;  %v2363_v35 = vpack.c.bf16 %v1234_v33, %v1230_v28  ;;  %v2237_v50 = vpack.c.bf16 %v1241_v11, %v1237_v42  ;;  %v1238_v36 = vld [vmem:[#allocation5 + $0x650] sm:$0xff]  ;;  %v1265_v28 = vld [vmem:[#allocation5 + $0x728] sm:$0xff] }
 0x3e4   : > { %v2365_v12 = vpack.c.bf16 %v1243_v19, %v1239_v44  ;;  %v2247_v33 = vpack.c.bf16 %v1256_v15, %v1252_v14  ;;  %v1260_v11 = vld [vmem:[#allocation5 + $0x700] sm:$0xff]  ;;  %v1285_v14 = vld [vmem:[#allocation5 + $0x7c8] sm:$0xff] }
 0x3e5   : > { %v757_v16 = vadd.f32 %v3140_v48, %v3136_v31  ;;  %v1264_v44 = vld [vmem:[#allocation5 + $0x720] sm:$0xff] }
 0x3e6   : > { %2224 = vmatpush1.bf16.msra.mxu1 %v2223_v54  ;;  %2352 = vmatpush1.bf16.msra.mxu0 %v2351_v17  ;;  %v1249_v54 = vld [vmem:[#allocation5 + $0x6a8] sm:$0xff]  ;;  %v1247_v17 = vld [vmem:[#allocation5 + $0x698] sm:$0xff] }
 0x3e7   : > { %2226 = vmatprep.subr.bf16.mxu1 %v2225_v57  ;;  %2354 = vmatprep.subr.bf16.mxu0 %v2353_v34  ;;  %v758_v56 = vadd.f32 %v757_v16, %v3144_v49  ;;  %v2239_v57 = vpack.c.bf16 %v1240_v52, %v1236_v51  ;;  %v2367_v34 = vpack.c.bf16 %v1242_v30, %v1238_v36  ;;  %v1266_v51 = vld [vmem:[#allocation5 + $0x730] sm:$0xff]  ;;  %v1269_v52 = vld [vmem:[#allocation5 + $0x748] sm:$0xff]  ;;  %v1275_v36 = vld [vmem:[#allocation5 + $0x778] sm:$0xff] }
 0x3e8   : > { %v2241_v46 = vpack.c.bf16 %v1249_v54, %v1245_v41  ;;  %v2369_v60 = vpack.c.bf16 %v1251_v55, %v1247_v17  ;;  %v1273_v16 = vld [vmem:[#allocation5 + $0x768] sm:$0xff]  ;;  %v2251_v41 = vpack.c.bf16 %v1264_v44, %v1260_v11  ;;  %v1268_v17 = vld [vmem:[#allocation5 + $0x740] sm:$0xff] }
 0x3e9   : > { %v759_v22 = vadd.f32 %v758_v56, %v3150_v53  ;;  %v1272_v55 = vld [vmem:[#allocation5 + $0x760] sm:$0xff]  ;;  %v2253_v56 = vpack.c.bf16 %v1273_v16, %v1269_v52  ;;  %v781_v44 = vld [vmem:[#allocation3 + $0x8] sm:$0xff] }
 0x3ea   : > { %2228 = vmatpush1.bf16.msra.mxu1 %v2227_v0  ;;  %2356 = vmatpush1.bf16.msra.mxu0 %v2355_v1  ;;  %v712_v0 = vmax.f32 %v3076_v45, %v3090_v47  ;;  %v1257_v1 = vld [vmem:[#allocation5 + $0x6e8] sm:$0xff] }
 0x3eb   : > { %2230 = vmatprep.subr.bf16.mxu1 %v2229_v7  ;;  %2358 = vmatprep.subr.bf16.mxu0 %v2357_v8  ;;  %v2243_v8 = vpack.c.bf16 %v1248_v59, %v1244_v58  ;;  %v760_v18 = vrot.slane %v759_v22, 4  ;;  %v2245_v20 = vpack.c.bf16 %v1257_v1, %v1253_v63  ;;  %v1274_v58 = vld [vmem:[#allocation5 + $0x770] sm:$0xff]  ;;  %v1277_v59 = vld [vmem:[#allocation5 + $0x788] sm:$0xff]  ;;  %v2255_v63 = vpack.c.bf16 %v1272_v55, %v1268_v17  ;;  %v1276_v1 = vld [vmem:[#allocation5 + $0x780] sm:$0xff] }
 0x3ec   : > { %v713_v7 = vmax.f32 %v712_v0, %v3102_v9  ;;  %v782_v17 = vld [vmem:[#allocation3 + $0x10] sm:$0xff] }
 0x3ed   : > { %v761_v19 = vadd.f32 %v760_v18, %v759_v22  ;;  %v1289_v18 = vld [vmem:[#allocation5 + $0x7e8] sm:$0xff]  ;;  %v786_v55 = vld [vmem:[#allocation3 + $0x30] sm:$0xff] }
 0x3ee   : > { %2232 = vmatpush1.bf16.msra.mxu1 %v2231_v23  ;;  %2360 = vmatpush1.bf16.msra.mxu0 %v2359_v24  ;;  %v1254_v23 = vld [vmem:[#allocation5 + $0x6d0] sm:$0xff]  ;;  %v714_v27 = vmax.f32 %v713_v7, %v3122_v29 }
 0x3ef   : > { %2234 = vmatprep.subr.bf16.mxu1 %v2233_v39  ;;  %2362 = vmatprep.subr.bf16.mxu0 %v2361_v32  ;;  %v1258_v24 = vld [vmem:[#allocation5 + $0x6f0] sm:$0xff]  ;;  %v1263_v39 = vld [vmem:[#allocation5 + $0x718] sm:$0xff]  ;;  %v762_v22 = vrot.slane %v761_v19, 2 }
 0x3f0   : > { %v1267_v32 = vld [vmem:[#allocation5 + $0x738] sm:$0xff]  ;;  %v2375_v42 = vpack.c.bf16 %v1258_v24, %v1254_v23  ;;  %v715_v30 = vrot.slane %v714_v27, 4  ;;  %v2259_v24 = vpack.c.bf16 %v1280_v2, %v1276_v1  ;;  %v794_v2 = vld [vmem:[#allocation3 + $0x70] sm:$0xff] }
 0x3f1   : > { %v763_v15 = vadd.f32 %v762_v22, %v761_v19  ;;  %v783_v19 = vld [vmem:[#allocation3 + $0x18] sm:$0xff] }
 0x3f2   : > { %2236 = vmatpush1.bf16.msra.mxu1 %v2235_v5  ;;  %2364 = vmatpush1.bf16.msra.mxu0 %v2363_v35  ;;  %v2249_v5 = vpack.c.bf16 %v1265_v28, %v1261_v25  ;;  %v2377_v35 = vpack.c.bf16 %v1267_v32, %v1263_v39  ;;  %v716_v62 = vmax.f32 %v714_v27, %v715_v30  ;;  %v1284_v27 = vld [vmem:[#allocation5 + $0x7c0] sm:$0xff] }
 0x3f3   : > { %2238 = vmatprep.subr.bf16.mxu1 %v2237_v50  ;;  %2366 = vmatprep.subr.bf16.mxu0 %v2365_v12  ;;  %v1262_v50 = vld [vmem:[#allocation5 + $0x710] sm:$0xff]  ;;  %v1271_v12 = vld [vmem:[#allocation5 + $0x758] sm:$0xff]  ;;  %v1288_v28 = vld [vmem:[#allocation5 + $0x7e0] sm:$0xff]  ;;  %v2261_v39 = vpack.c.bf16 %v1289_v18, %v1285_v14  ;;  %v764_v11 = vrot.slane %v763_v15, 1 }
 0x3f4   : > { %v2379_v54 = vpack.c.bf16 %v1266_v51, %v1262_v50  ;;  %v717_v23 = vrot.slane %v716_v62, 2  ;;  %v2263_v51 = vpack.c.bf16 %v1288_v28, %v1284_v27  ;;  %v780_v30 = vld [vmem:[#allocation3] sm:$0xff]  ;;  %v805_v27 = vld [vmem:[#allocation3 + $0xc8] sm:$0xff] }
 0x3f5   : > { %v765_v16 = vadd.f32 %v764_v11, %v763_v15  ;;  %v809_v28 = vld [vmem:[#allocation3 + $0xe8] sm:$0xff] }
 0x3f6   : > { %2240 = vmatpush1.bf16.msra.mxu1 %v2239_v57  ;;  %2368 = vmatpush1.bf16.msra.mxu0 %v2367_v34  ;;  %v2381_v57 = vpack.c.bf16 %v1275_v36, %v1271_v12  ;;  %v1270_v34 = vld [vmem:[#allocation5 + $0x750] sm:$0xff]  ;;  %v718_v50 = vmax.f32 %v716_v62, %v717_v23  ;;  %v2405_v11 = vpack.c.bf16 %v809_v28, %v805_v27  ;;  %v837_v27 = vld [vmem:[#allocation3 + $0x1c8] sm:$0xff] }
 0x3f7   : > { %2242 = vmatprep.subr.bf16.mxu1 %v2241_v46  ;;  %2370 = vmatprep.subr.bf16.mxu0 %v2369_v60  ;;  %v1281_v46 = vld [vmem:[#allocation5 + $0x7a8] sm:$0xff]  ;;  %v1279_v60 = vld [vmem:[#allocation5 + $0x798] sm:$0xff]  ;;  %v2383_v0 = vpack.c.bf16 %v1274_v58, %v1270_v34  ;;  %v778_v22 = vmul.f32 0.03125, %v765_v16  ;;  %v790_v62 = vld [vmem:[#allocation3 + $0x50] sm:$0xff] }
 0x3f8   : > { %v2257_v6 = vpack.c.bf16 %v1281_v46, %v1277_v59  ;;  %v2385_v7 = vpack.c.bf16 %v1283_v61, %v1279_v60  ;;  %v791_v34 = vld [vmem:[#allocation3 + $0x58] sm:$0xff]  ;;  %v2523_v46 = vpack.c.bf16 %v786_v55, %v782_v17  ;;  %v788_v60 = vld [vmem:[#allocation3 + $0x40] sm:$0xff]  ;;  %v2527_v15 = vpack.c.bf16 %v794_v2, %v790_v62  ;;  %v798_v23 = vld [vmem:[#allocation3 + $0x90] sm:$0xff] }
 0x3f9   : > { %v795_v58 = vld [vmem:[#allocation3 + $0x78] sm:$0xff]  ;;  %v792_v61 = vld [vmem:[#allocation3 + $0x60] sm:$0xff]  ;;  %v814_v55 = vld [vmem:[#allocation3 + $0x110] sm:$0xff] }
 0x3fa   : > { %2244 = vmatpush1.bf16.msra.mxu1 %v2243_v8  ;;  %2372 = vmatpush1.bf16.msra.mxu0 %v2371_v13  ;;  %v1278_v8 = vld [vmem:[#allocation5 + $0x790] sm:$0xff]  ;;  %v2525_v1 = vpack.c.bf16 %v795_v58, %v791_v34  ;;  %v2399_v14 = vpack.c.bf16 %v792_v61, %v788_v60  ;;  %v815_v16 = vld [vmem:[#allocation3 + $0x118] sm:$0xff]  ;;  %v816_v17 = vld [vmem:[#allocation3 + $0x120] sm:$0xff] }
 0x3fb   : > { %2246 = vmatprep.subr.bf16.mxu1 %v2245_v20  ;;  %2374 = vmatprep.subr.bf16.mxu0 %v2373_v21  ;;  %v1282_v13 = vld [vmem:[#allocation5 + $0x7b0] sm:$0xff]  ;;  %v1287_v20 = vld [vmem:[#allocation5 + $0x7d8] sm:$0xff]  ;;  %v821_v34 = vld [vmem:[#allocation3 + $0x148] sm:$0xff] }
 0x3fc   : > { %v1291_v21 = vld [vmem:[#allocation5 + $0x7f8] sm:$0xff]  ;;  %v2387_v25 = vpack.c.bf16 %v1282_v13, %v1278_v8  ;;  %v825_v58 = vld [vmem:[#allocation3 + $0x168] sm:$0xff]  ;;  %v820_v62 = vld [vmem:[#allocation3 + $0x140] sm:$0xff] }
 0x3fd   : > { %v2389_v32 = vpack.c.bf16 %v1291_v21, %v1287_v20  ;;  %v799_v8 = vld [vmem:[#allocation3 + $0x98] sm:$0xff]  ;;  %v796_v20 = vld [vmem:[#allocation3 + $0x80] sm:$0xff]  ;;  %v2413_v61 = vpack.c.bf16 %v825_v58, %v821_v34  ;;  %v826_v2 = vld [vmem:[#allocation3 + $0x170] sm:$0xff] }
 0x3fe   : > { %2248 = vmatpush1.bf16.msra.mxu1 %v2247_v33  ;;  %2376 = vmatpush1.bf16.msra.mxu0 %v2375_v42  ;;  %v1286_v33 = vld [vmem:[#allocation5 + $0x7d0] sm:$0xff]  ;;  %v803_v13 = vld [vmem:[#allocation3 + $0xb8] sm:$0xff]  ;;  %v800_v21 = vld [vmem:[#allocation3 + $0xa0] sm:$0xff] }
 0x3ff   : > { %2250 = vmatprep.subr.bf16.mxu1 %v2249_v5  ;;  %2378 = vmatprep.subr.bf16.mxu0 %v2377_v35  ;;  %v1290_v42 = vld [vmem:[#allocation5 + $0x7f0] sm:$0xff]  ;;  %v785_v5 = vld [vmem:[#allocation3 + $0x28] sm:$0xff]  ;;  %v787_v35 = vld [vmem:[#allocation3 + $0x38] sm:$0xff] }
 0x400   : > { %v2391_v52 = vpack.c.bf16 %v1290_v42, %v1286_v33  ;;  %v2393_v12 = vpack.c.bf16 %v785_v5, %v781_v44  ;;  %v2521_v36 = vpack.c.bf16 %v787_v35, %v783_v19  ;;  %v2403_v33 = vpack.c.bf16 %v800_v21, %v796_v20  ;;  %v804_v44 = vld [vmem:[#allocation3 + $0xc0] sm:$0xff]  ;;  %v806_v19 = vld [vmem:[#allocation3 + $0xd0] sm:$0xff]  ;;  %v841_v28 = vld [vmem:[#allocation3 + $0x1e8] sm:$0xff] }
 0x401   : > { %v808_v5 = vld [vmem:[#allocation3 + $0xe0] sm:$0xff]  ;;  %v853_v34 = vld [vmem:[#allocation3 + $0x248] sm:$0xff] }
 0x402   : > { %2252 = vmatpush1.bf16.msra.mxu1 %v2251_v41  ;;  %2380 = vmatpush1.bf16.msra.mxu0 %v2379_v54  ;;  %v784_v41 = vld [vmem:[#allocation3 + $0x20] sm:$0xff]  ;;  %v719_v54 = vrot.slane %v718_v50, 1  ;;  %v857_v58 = vld [vmem:[#allocation3 + $0x268] sm:$0xff] }
 0x403   : > { %2254 = vmatprep.subr.bf16.mxu1 %v2253_v56  ;;  %2382 = vmatprep.subr.bf16.mxu0 %v2381_v57  ;;  %v789_v56 = vld [vmem:[#allocation3 + $0x48] sm:$0xff]  ;;  %v2395_v59 = vpack.c.bf16 %v784_v41, %v780_v30  ;;  %v828_v20 = vld [vmem:[#allocation3 + $0x180] sm:$0xff] }
 0x404   : > { %v793_v57 = vld [vmem:[#allocation3 + $0x68] sm:$0xff]  ;;  %v832_v21 = vld [vmem:[#allocation3 + $0x1a0] sm:$0xff] }
 0x406   : > { %2256 = vmatpush1.bf16.msra.mxu1 %v2255_v63  ;;  %2384 = vmatpush1.bf16.msra.mxu0 %v2383_v0  ;;  %v720_v63 = vmax.f32 %v718_v50, %v719_v54  ;;  %v2397_v0 = vpack.c.bf16 %v793_v57, %v789_v56  ;;  %v810_v50 = vld [vmem:[#allocation3 + $0xf0] sm:$0xff]  ;;  %v812_v54 = vld [vmem:[#allocation3 + $0x100] sm:$0xff] }
 0x407   : > { %2258 = vmatprep.subr.bf16.mxu1 %v2257_v6  ;;  %2386 = vmatprep.subr.bf16.mxu0 %v2385_v7  ;;  %v797_v6 = vld [vmem:[#allocation3 + $0x88] sm:$0xff]  ;;  %v2535_v30 = vpack.c.bf16 %v810_v50, %v806_v19  ;;  %v818_v57 = vld [vmem:[#allocation3 + $0x130] sm:$0xff] }
 0x408   : > { %v801_v7 = vld [vmem:[#allocation3 + $0xa8] sm:$0xff]  ;;  %v2539_v60 = vpack.c.bf16 %v818_v57, %v814_v55  ;;  %v838_v19 = vld [vmem:[#allocation3 + $0x1d0] sm:$0xff] }
 0x409   : > { %v2401_v18 = vpack.c.bf16 %v801_v7, %v797_v6  ;;  %v829_v6 = vld [vmem:[#allocation3 + $0x188] sm:$0xff]  ;;  %v842_v50 = vld [vmem:[#allocation3 + $0x1f0] sm:$0xff] }
 0x40a   : > { %2260 = vmatpush1.bf16.msra.mxu1 %v2259_v24  ;;  %2388 = vmatpush1.bf16.msra.mxu0 %v2387_v25  ;;  %v2529_v24 = vpack.c.bf16 %v803_v13, %v799_v8  ;;  %v802_v25 = vld [vmem:[#allocation3 + $0xb0] sm:$0xff]  ;;  %v833_v7 = vld [vmem:[#allocation3 + $0x1a8] sm:$0xff]  ;;  %v831_v8 = vld [vmem:[#allocation3 + $0x198] sm:$0xff] }
 0x40b   : > { %2262 = vmatprep.subr.bf16.mxu1 %v2261_v39  ;;  %2390 = vmatprep.subr.bf16.mxu0 %v2389_v32  ;;  %v807_v39 = vld [vmem:[#allocation3 + $0xd8] sm:$0xff]  ;;  %v2531_v42 = vpack.c.bf16 %v802_v25, %v798_v23  ;;  %v830_v23 = vld [vmem:[#allocation3 + $0x190] sm:$0xff] }
 0x40c   : > { %v811_v32 = vld [vmem:[#allocation3 + $0xf8] sm:$0xff]  ;;  %v834_v25 = vld [vmem:[#allocation3 + $0x1b0] sm:$0xff] }
 0x40d   : > { %v2533_v35 = vpack.c.bf16 %v811_v32, %v807_v39  ;;  %v835_v13 = vld [vmem:[#allocation3 + $0x1b8] sm:$0xff]  ;;  %v846_v55 = vld [vmem:[#allocation3 + $0x210] sm:$0xff] }
 0x40e   : > { %2264 = vmatpush1.bf16.msra.mxu1 %v2263_v51  ;;  %2392 = vmatpush1.bf16.msra.mxu0 %v2391_v52  ;;  %v813_v51 = vld [vmem:[#allocation3 + $0x108] sm:$0xff]  ;;  %v839_v39 = vld [vmem:[#allocation3 + $0x1d8] sm:$0xff]  ;;  %v850_v57 = vld [vmem:[#allocation3 + $0x230] sm:$0xff] }
 0x40f   : > { %2394 = vmatprep.subr.bf16.mxu1 %v2393_v12  ;;  %2522 = vmatprep.subr.bf16.mxu0 %v2521_v36  ;;  %v817_v52 = vld [vmem:[#allocation3 + $0x128] sm:$0xff]  ;;  %v819_v12 = vld [vmem:[#allocation3 + $0x138] sm:$0xff]  ;;  %v2407_v36 = vpack.c.bf16 %v808_v5, %v804_v44  ;;  %v836_v44 = vld [vmem:[#allocation3 + $0x1c0] sm:$0xff] }
 0x410   : > { %v2409_v41 = vpack.c.bf16 %v817_v52, %v813_v51  ;;  %v2537_v56 = vpack.c.bf16 %v819_v12, %v815_v16  ;;  %v843_v32 = vld [vmem:[#allocation3 + $0x1f8] sm:$0xff]  ;;  %v840_v5 = vld [vmem:[#allocation3 + $0x1e0] sm:$0xff]  ;;  %v845_v51 = vld [vmem:[#allocation3 + $0x208] sm:$0xff] }
 0x411   : > { %1428 = vmatmul.mubr.f32.vlgmr.msra.gmra.mrb[4].mxu1 %v778_v22  ;;  %1570 = vmatmul.mubr.f32.vlgmr.msra.gmra.mrb[2].mxu0 %v778_v22  ;;  %v827_v22 = vld [vmem:[#allocation3 + $0x178] sm:$0xff]  ;;  %v849_v52 = vld [vmem:[#allocation3 + $0x228] sm:$0xff] }
 0x412   : > { %2396 = vmatpush1.bf16.msra.mxu1 %v2395_v59  ;;  %1640 = vmatprep.mubr.f32.mxu1 %v720_v63  ;;  %v823_v59 = vld [vmem:[#allocation3 + $0x158] sm:$0xff] }
 0x413   : > { %2524 = vmatpush1.bf16.msra.mxu0 %v2523_v46  ;;  %1782 = vmatprep.mubr.f32.mxu0 %v720_v63  ;;  %v2411_v46 = vpack.c.bf16 %v816_v17, %v812_v54  ;;  %v824_v63 = vld [vmem:[#allocation3 + $0x160] sm:$0xff]  ;;  %v847_v16 = vld [vmem:[#allocation3 + $0x218] sm:$0xff] }
 0x414   : > { %2398 = vmatprep.subr.bf16.mxu1 %v2397_v0  ;;  %2526 = vmatprep.subr.bf16.mxu0 %v2525_v1  ;;  %v822_v0 = vld [vmem:[#allocation3 + $0x150] sm:$0xff]  ;;  %v2541_v1 = vpack.c.bf16 %v827_v22, %v823_v59  ;;  %v851_v12 = vld [vmem:[#allocation3 + $0x238] sm:$0xff]  ;;  %v844_v54 = vld [vmem:[#allocation3 + $0x200] sm:$0xff] }
 0x415   : > { %v848_v17 = vld [vmem:[#allocation3 + $0x220] sm:$0xff]  ;;  %v855_v59 = vld [vmem:[#allocation3 + $0x258] sm:$0xff] }
 0x416   : > { %2400 = vmatpush1.bf16.msra.mxu1 %v2399_v14  ;;  %v2415_v14 = vpack.c.bf16 %v824_v63, %v820_v62  ;;  %v859_v22 = vld [vmem:[#allocation3 + $0x278] sm:$0xff]  ;;  %v852_v62 = vld [vmem:[#allocation3 + $0x240] sm:$0xff] }
 0x417   : > { %2528 = vmatpush1.bf16.msra.mxu0 %v2527_v15  ;;  %2402 = vmatprep.subr.bf16.mxu1 %v2401_v18  ;;  %v2543_v15 = vpack.c.bf16 %v826_v2, %v822_v0  ;;  %v2417_v18 = vpack.c.bf16 %v833_v7, %v829_v6  ;;  %v856_v63 = vld [vmem:[#allocation3 + $0x260] sm:$0xff]  ;;  %v854_v0 = vld [vmem:[#allocation3 + $0x250] sm:$0xff]  ;;  %v861_v6 = vld [vmem:[#allocation3 + $0x288] sm:$0xff] }
 0x418   : > { %2530 = vmatprep.subr.bf16.mxu0 %v2529_v24  ;;  %v2545_v24 = vpack.c.bf16 %v835_v13, %v831_v8  ;;  %v858_v2 = vld [vmem:[#allocation3 + $0x270] sm:$0xff]  ;;  %v865_v7 = vld [vmem:[#allocation3 + $0x2a8] sm:$0xff]  ;;  %v863_v8 = vld [vmem:[#allocation3 + $0x298] sm:$0xff] }
 0x419   : > { %v867_v13 = vld [vmem:[#allocation3 + $0x2b8] sm:$0xff] }
 0x41a   : > { %2404 = vmatpush1.bf16.msra.mxu1 %v2403_v33  ;;  %v2419_v33 = vpack.c.bf16 %v832_v21, %v828_v20  ;;  %v2559_v20 = vpack.c.bf16 %v858_v2, %v854_v0  ;;  %v2433_v21 = vpack.c.bf16 %v865_v7, %v861_v6  ;;  %v887_v0 = vld [vmem:[#allocation3 + $0x358] sm:$0xff] }
 0x41b   : > { %2532 = vmatpush1.bf16.msra.mxu0 %v2531_v42  ;;  %2406 = vmatprep.subr.bf16.mxu1 %v2405_v11  ;;  %v2547_v42 = vpack.c.bf16 %v834_v25, %v830_v23  ;;  %v2421_v11 = vpack.c.bf16 %v841_v28, %v837_v27  ;;  %v864_v23 = vld [vmem:[#allocation3 + $0x2a0] sm:$0xff]  ;;  %v866_v25 = vld [vmem:[#allocation3 + $0x2b0] sm:$0xff]  ;;  %v2561_v27 = vpack.c.bf16 %v867_v13, %v863_v8  ;;  %v869_v28 = vld [vmem:[#allocation3 + $0x2c8] sm:$0xff] }
 0x41c   : > { %2534 = vmatprep.subr.bf16.mxu0 %v2533_v35  ;;  %v2549_v35 = vpack.c.bf16 %v843_v32, %v839_v39  ;;  %v873_v39 = vld [vmem:[#allocation3 + $0x2e8] sm:$0xff] }
 0x41e   : > { %2408 = vmatpush1.bf16.msra.mxu1 %v2407_v36  ;;  %v2423_v36 = vpack.c.bf16 %v840_v5, %v836_v44 }
 0x41f   : > { %2536 = vmatpush1.bf16.msra.mxu0 %v2535_v30  ;;  %2410 = vmatprep.subr.bf16.mxu1 %v2409_v41  ;;  %v2551_v30 = vpack.c.bf16 %v842_v50, %v838_v19  ;;  %v2425_v41 = vpack.c.bf16 %v849_v52, %v845_v51  ;;  %v2437_v50 = vpack.c.bf16 %v873_v39, %v869_v28  ;;  %v868_v51 = vld [vmem:[#allocation3 + $0x2c0] sm:$0xff] }
 0x420   : > { %2538 = vmatprep.subr.bf16.mxu0 %v2537_v56  ;;  %v2553_v56 = vpack.c.bf16 %v851_v12, %v847_v16  ;;  %v872_v52 = vld [vmem:[#allocation3 + $0x2e0] sm:$0xff]  ;;  %v870_v16 = vld [vmem:[#allocation3 + $0x2d0] sm:$0xff] }
 0x422   : > { %2412 = vmatpush1.bf16.msra.mxu1 %v2411_v46  ;;  %v2427_v46 = vpack.c.bf16 %v848_v17, %v844_v54  ;;  %v879_v17 = vld [vmem:[#allocation3 + $0x318] sm:$0xff] }
 0x423   : > { %2540 = vmatpush1.bf16.msra.mxu0 %v2539_v60  ;;  %2414 = vmatprep.subr.bf16.mxu1 %v2413_v61  ;;  %v2555_v60 = vpack.c.bf16 %v850_v57, %v846_v55  ;;  %v2429_v61 = vpack.c.bf16 %v857_v58, %v853_v34  ;;  %v883_v55 = vld [vmem:[#allocation3 + $0x338] sm:$0xff] }
 0x424   : > { %2542 = vmatprep.subr.bf16.mxu0 %v2541_v1  ;;  %v2557_v1 = vpack.c.bf16 %v859_v22, %v855_v59  ;;  %v876_v59 = vld [vmem:[#allocation3 + $0x300] sm:$0xff] }
 0x425   : > { %v880_v22 = vld [vmem:[#allocation3 + $0x320] sm:$0xff] }
 0x426   : > { %2416 = vmatpush1.bf16.msra.mxu1 %v2415_v14  ;;  %v2431_v14 = vpack.c.bf16 %v856_v63, %v852_v62  ;;  %v885_v62 = vld [vmem:[#allocation3 + $0x348] sm:$0xff]  ;;  %v2443_v6 = vpack.c.bf16 %v880_v22, %v876_v59  ;;  %v911_v22 = vld [vmem:[#allocation3 + $0x418] sm:$0xff] }
 0x427   : > { %2544 = vmatpush1.bf16.msra.mxu0 %v2543_v15  ;;  %2418 = vmatprep.subr.bf16.mxu1 %v2417_v18  ;;  %v860_v15 = vld [vmem:[#allocation3 + $0x280] sm:$0xff]  ;;  %v703_v18 = vmax.f32 %v3072_v37, %v3086_v43  ;;  %v889_v63 = vld [vmem:[#allocation3 + $0x368] sm:$0xff] }
 0x428   : > { %2546 = vmatprep.subr.bf16.mxu0 %v2545_v24  ;;  %v862_v24 = vld [vmem:[#allocation3 + $0x290] sm:$0xff]  ;;  %v2435_v44 = vpack.c.bf16 %v864_v23, %v860_v15  ;;  %v2445_v13 = vpack.c.bf16 %v889_v63, %v885_v62  ;;  %v888_v15 = vld [vmem:[#allocation3 + $0x360] sm:$0xff]  ;;  %v893_v23 = vld [vmem:[#allocation3 + $0x388] sm:$0xff] }
 0x429   : > { %v704_v32 = vmax.f32 %v703_v18, %v3098_v4  ;;  %v2563_v5 = vpack.c.bf16 %v866_v25, %v862_v24  ;;  %v886_v18 = vld [vmem:[#allocation3 + $0x350] sm:$0xff]  ;;  %v897_v24 = vld [vmem:[#allocation3 + $0x3a8] sm:$0xff]  ;;  %v895_v25 = vld [vmem:[#allocation3 + $0x398] sm:$0xff] }
 0x42a   : > { %2420 = vmatpush1.bf16.msra.mxu1 %v2419_v33  ;;  %v730_v33 = vmax.f32 %v3080_v40, %v3094_v3  ;;  %v913_v59 = vld [vmem:[#allocation3 + $0x428] sm:$0xff] }
 0x42b   : > { %2548 = vmatpush1.bf16.msra.mxu0 %v2547_v42  ;;  %2422 = vmatprep.subr.bf16.mxu1 %v2421_v11  ;;  %v871_v42 = vld [vmem:[#allocation3 + $0x2d8] sm:$0xff] }
 0x42c   : > { %2550 = vmatprep.subr.bf16.mxu0 %v2549_v35  ;;  %v875_v11 = vld [vmem:[#allocation3 + $0x2f8] sm:$0xff]  ;;  %v731_v19 = vmax.f32 %v730_v33, %v3106_v10  ;;  %v705_v35 = vmax.f32 %v704_v32, %v3118_v26  ;;  %v2449_v33 = vpack.c.bf16 %v897_v24, %v893_v23 }
 0x42d   : > { %v2565_v12 = vpack.c.bf16 %v875_v11, %v871_v42  ;;  %v892_v42 = vld [vmem:[#allocation3 + $0x380] sm:$0xff] }
 0x42e   : > { %2424 = vmatpush1.bf16.msra.mxu1 %v2423_v36  ;;  %v874_v36 = vld [vmem:[#allocation3 + $0x2f0] sm:$0xff]  ;;  %v732_v54 = vmax.f32 %v731_v19, %v3126_v38  ;;  %v706_v57 = vrot.slane %v705_v35, 4  ;;  %v896_v11 = vld [vmem:[#allocation3 + $0x3a0] sm:$0xff] }
 0x42f   : > { %2552 = vmatpush1.bf16.msra.mxu0 %v2551_v30  ;;  %2426 = vmatprep.subr.bf16.mxu1 %v2425_v41  ;;  %v877_v30 = vld [vmem:[#allocation3 + $0x308] sm:$0xff]  ;;  %v2567_v34 = vpack.c.bf16 %v874_v36, %v870_v16  ;;  %v907_v16 = vld [vmem:[#allocation3 + $0x3f8] sm:$0xff]  ;;  %v2451_v36 = vpack.c.bf16 %v896_v11, %v892_v42 }
 0x430   : > { %2554 = vmatprep.subr.bf16.mxu0 %v2553_v56  ;;  %v881_v41 = vld [vmem:[#allocation3 + $0x328] sm:$0xff]  ;;  %v2439_v56 = vpack.c.bf16 %v872_v52, %v868_v51  ;;  %v733_v2 = vrot.slane %v732_v54, 4  ;;  %v707_v7 = vmax.f32 %v705_v35, %v706_v57  ;;  %v898_v35 = vld [vmem:[#allocation3 + $0x3b0] sm:$0xff]  ;;  %v903_v52 = vld [vmem:[#allocation3 + $0x3d8] sm:$0xff] }
 0x431   : > { %v2441_v58 = vpack.c.bf16 %v881_v41, %v877_v30  ;;  %v905_v51 = vld [vmem:[#allocation3 + $0x3e8] sm:$0xff]  ;;  %v2581_v57 = vpack.c.bf16 %v907_v16, %v903_v52  ;;  %v924_v52 = vld [vmem:[#allocation3 + $0x480] sm:$0xff] }
 0x432   : > { %2428 = vmatpush1.bf16.msra.mxu1 %v2427_v46  ;;  %v878_v46 = vld [vmem:[#allocation3 + $0x310] sm:$0xff]  ;;  %v734_v28 = vmax.f32 %v732_v54, %v733_v2  ;;  %v900_v54 = vld [vmem:[#allocation3 + $0x3c0] sm:$0xff]  ;;  %v929_v42 = vld [vmem:[#allocation3 + $0x4a8] sm:$0xff] }
 0x433   : > { %2556 = vmatpush1.bf16.msra.mxu0 %v2555_v60  ;;  %2430 = vmatprep.subr.bf16.mxu1 %v2429_v61  ;;  %v2569_v60 = vpack.c.bf16 %v883_v55, %v879_v17  ;;  %v882_v61 = vld [vmem:[#allocation3 + $0x330] sm:$0xff]  ;;  %v904_v17 = vld [vmem:[#allocation3 + $0x3e0] sm:$0xff] }
 0x434   : > { %2558 = vmatprep.subr.bf16.mxu0 %v2557_v1  ;;  %v891_v1 = vld [vmem:[#allocation3 + $0x378] sm:$0xff]  ;;  %v2571_v8 = vpack.c.bf16 %v882_v61, %v878_v46  ;;  %v902_v55 = vld [vmem:[#allocation3 + $0x3d0] sm:$0xff]  ;;  %v2455_v61 = vpack.c.bf16 %v904_v17, %v900_v54  ;;  %v912_v2 = vld [vmem:[#allocation3 + $0x420] sm:$0xff] }
 0x435   : > { %v915_v46 = vld [vmem:[#allocation3 + $0x438] sm:$0xff]  ;;  %v928_v16 = vld [vmem:[#allocation3 + $0x4a0] sm:$0xff]  ;;  %v937_v54 = vld [vmem:[#allocation3 + $0x4e8] sm:$0xff] }
 0x436   : > { %2432 = vmatpush1.bf16.msra.mxu1 %v2431_v14  ;;  %v884_v14 = vld [vmem:[#allocation3 + $0x340] sm:$0xff]  ;;  %v935_v17 = vld [vmem:[#allocation3 + $0x4d8] sm:$0xff] }
 0x437   : > { %2560 = vmatpush1.bf16.msra.mxu0 %v2559_v20  ;;  %2434 = vmatprep.subr.bf16.mxu1 %v2433_v21  ;;  %v2573_v20 = vpack.c.bf16 %v891_v1, %v887_v0  ;;  %v890_v21 = vld [vmem:[#allocation3 + $0x370] sm:$0xff]  ;;  %v2447_v39 = vpack.c.bf16 %v888_v15, %v884_v14  ;;  %v908_v1 = vld [vmem:[#allocation3 + $0x400] sm:$0xff]  ;;  %v917_v14 = vld [vmem:[#allocation3 + $0x448] sm:$0xff] }
 0x438   : > { %2562 = vmatprep.subr.bf16.mxu0 %v2561_v27  ;;  %v899_v27 = vld [vmem:[#allocation3 + $0x3b8] sm:$0xff]  ;;  %v2575_v32 = vpack.c.bf16 %v890_v21, %v886_v18  ;;  %v921_v15 = vld [vmem:[#allocation3 + $0x468] sm:$0xff]  ;;  %v2459_v18 = vpack.c.bf16 %v912_v2, %v908_v1 }
 0x439   : > { %v2577_v19 = vpack.c.bf16 %v899_v27, %v895_v25  ;;  %v923_v21 = vld [vmem:[#allocation3 + $0x478] sm:$0xff]  ;;  %v916_v25 = vld [vmem:[#allocation3 + $0x440] sm:$0xff] }
 0x43a   : > { %2436 = vmatpush1.bf16.msra.mxu1 %v2435_v44  ;;  %v894_v44 = vld [vmem:[#allocation3 + $0x390] sm:$0xff]  ;;  %v920_v27 = vld [vmem:[#allocation3 + $0x460] sm:$0xff] }
 0x43b   : > { %2564 = vmatpush1.bf16.msra.mxu0 %v2563_v5  ;;  %2438 = vmatprep.subr.bf16.mxu1 %v2437_v50  ;;  %v708_v5 = vrot.slane %v707_v7, 2  ;;  %v901_v50 = vld [vmem:[#allocation3 + $0x3c8] sm:$0xff]  ;;  %v2579_v30 = vpack.c.bf16 %v898_v35, %v894_v44  ;;  %v2463_v35 = vpack.c.bf16 %v920_v27, %v916_v25 }
 0x43c   : > { %2566 = vmatprep.subr.bf16.mxu0 %v2565_v12  ;;  %v735_v12 = vrot.slane %v734_v28, 2  ;;  %v2453_v41 = vpack.c.bf16 %v905_v51, %v901_v50 }
 0x43e   : > { %2440 = vmatpush1.bf16.msra.mxu1 %v2439_v56  ;;  %v709_v56 = vmax.f32 %v707_v7, %v708_v5  ;;  %v910_v7 = vld [vmem:[#allocation3 + $0x410] sm:$0xff]  ;;  %v927_v5 = vld [vmem:[#allocation3 + $0x498] sm:$0xff] }
 0x43f   : > { %2568 = vmatpush1.bf16.msra.mxu0 %v2567_v34  ;;  %2442 = vmatprep.subr.bf16.mxu1 %v2441_v58  ;;  %v906_v34 = vld [vmem:[#allocation3 + $0x3f0] sm:$0xff]  ;;  %v909_v58 = vld [vmem:[#allocation3 + $0x408] sm:$0xff] }
 0x440   : > { %2570 = vmatprep.subr.bf16.mxu0 %v2569_v60  ;;  %v736_v60 = vmax.f32 %v734_v28, %v735_v12  ;;  %v2583_v62 = vpack.c.bf16 %v906_v34, %v902_v55  ;;  %v710_v63 = vrot.slane %v709_v56, 1  ;;  %v2457_v0 = vpack.c.bf16 %v913_v59, %v909_v58  ;;  %v918_v28 = vld [vmem:[#allocation3 + $0x450] sm:$0xff]  ;;  %v939_v55 = vld [vmem:[#allocation3 + $0x4f8] sm:$0xff]  ;;  %v932_v58 = vld [vmem:[#allocation3 + $0x4c0] sm:$0xff] }
 0x441   : > { %v926_v12 = vld [vmem:[#allocation3 + $0x490] sm:$0xff]  ;;  %v936_v59 = vld [vmem:[#allocation3 + $0x4e0] sm:$0xff] }
 0x442   : > { %2444 = vmatpush1.bf16.msra.mxu1 %v2443_v6  ;;  %v2585_v6 = vpack.c.bf16 %v915_v46, %v911_v22  ;;  %v711_v23 = vmax.f32 %v709_v56, %v710_v63  ;;  %v2467_v56 = vpack.c.bf16 %v928_v16, %v924_v52  ;;  %v934_v22 = vld [vmem:[#allocation3 + $0x4d0] sm:$0xff]  ;;  %v2597_v46 = vpack.c.bf16 %v939_v55, %v935_v17  ;;  %v943_v63 = vld [vmem:[#allocation3 + $0x518] sm:$0xff]  ;;  %v956_v52 = vld [vmem:[#allocation3 + $0x580] sm:$0xff] }
 0x443   : > { %2572 = vmatpush1.bf16.msra.mxu0 %v2571_v8  ;;  %2446 = vmatprep.subr.bf16.mxu1 %v2445_v13  ;;  %v914_v8 = vld [vmem:[#allocation3 + $0x430] sm:$0xff]  ;;  %v737_v13 = vrot.slane %v736_v60, 1  ;;  %v2471_v1 = vpack.c.bf16 %v936_v59, %v932_v58  ;;  %v960_v16 = vld [vmem:[#allocation3 + $0x5a0] sm:$0xff]  ;;  %v967_v17 = vld [vmem:[#allocation3 + $0x5d8] sm:$0xff] }
 0x444   : > { %2574 = vmatprep.subr.bf16.mxu0 %v2573_v20  ;;  %v919_v20 = vld [vmem:[#allocation3 + $0x458] sm:$0xff]  ;;  %v2587_v24 = vpack.c.bf16 %v914_v8, %v910_v7  ;;  %v940_v7 = vld [vmem:[#allocation3 + $0x500] sm:$0xff] }
 0x445   : > { %v738_v11 = vmax.f32 %v736_v60, %v737_v13  ;;  %v2589_v44 = vpack.c.bf16 %v923_v21, %v919_v20  ;;  %v938_v60 = vld [vmem:[#allocation3 + $0x4f0] sm:$0xff]  ;;  %v944_v8 = vld [vmem:[#allocation3 + $0x520] sm:$0xff]  ;;  %v953_v20 = vld [vmem:[#allocation3 + $0x568] sm:$0xff] }
 0x446   : > { %2448 = vmatpush1.bf16.msra.mxu1 %v2447_v39  ;;  %v2461_v39 = vpack.c.bf16 %v921_v15, %v917_v14  ;;  %v2599_v2 = vpack.c.bf16 %v938_v60, %v934_v22  ;;  %v942_v13 = vld [vmem:[#allocation3 + $0x510] sm:$0xff]  ;;  %v951_v21 = vld [vmem:[#allocation3 + $0x558] sm:$0xff]  ;;  %v964_v58 = vld [vmem:[#allocation3 + $0x5c0] sm:$0xff] }
 0x447   : > { %2576 = vmatpush1.bf16.msra.mxu0 %v2575_v32  ;;  %2450 = vmatprep.subr.bf16.mxu1 %v2449_v33  ;;  %v922_v32 = vld [vmem:[#allocation3 + $0x470] sm:$0xff]  ;;  %v925_v33 = vld [vmem:[#allocation3 + $0x488] sm:$0xff]  ;;  %v971_v55 = vld [vmem:[#allocation3 + $0x5f8] sm:$0xff] }
 0x448   : > { %2578 = vmatprep.subr.bf16.mxu0 %v2577_v19  ;;  %v931_v19 = vld [vmem:[#allocation3 + $0x4b8] sm:$0xff]  ;;  %v2591_v50 = vpack.c.bf16 %v922_v32, %v918_v28  ;;  %v2465_v51 = vpack.c.bf16 %v929_v42, %v925_v33  ;;  %v946_v15 = vld [vmem:[#allocation3 + $0x530] sm:$0xff]  ;;  %v948_v28 = vld [vmem:[#allocation3 + $0x540] sm:$0xff] }
 0x449   : > { %v2603_v25 = vpack.c.bf16 %v946_v15, %v942_v13  ;;  %v950_v32 = vld [vmem:[#allocation3 + $0x550] sm:$0xff]  ;;  %v968_v59 = vld [vmem:[#allocation3 + $0x5e0] sm:$0xff] }
 0x44a   : > { %2452 = vmatpush1.bf16.msra.mxu1 %v2451_v36  ;;  %v2593_v36 = vpack.c.bf16 %v931_v19, %v927_v5  ;;  %v954_v42 = vld [vmem:[#allocation3 + $0x570] sm:$0xff]  ;;  %v959_v5 = vld [vmem:[#allocation3 + $0x598] sm:$0xff] }
 0x44b   : > { %2580 = vmatpush1.bf16.msra.mxu0 %v2579_v30  ;;  %2454 = vmatprep.subr.bf16.mxu1 %v2453_v41  ;;  %v930_v30 = vld [vmem:[#allocation3 + $0x4b0] sm:$0xff]  ;;  %v933_v41 = vld [vmem:[#allocation3 + $0x4c8] sm:$0xff]  ;;  %v963_v19 = vld [vmem:[#allocation3 + $0x5b8] sm:$0xff] }
 0x44c   : > { %2582 = vmatprep.subr.bf16.mxu0 %v2581_v57  ;;  %v2595_v57 = vpack.c.bf16 %v930_v30, %v926_v12  ;;  %v2469_v34 = vpack.c.bf16 %v937_v54, %v933_v41  ;;  %v958_v12 = vld [vmem:[#allocation3 + $0x590] sm:$0xff]  ;;  %v965_v41 = vld [vmem:[#allocation3 + $0x5c8] sm:$0xff] }
 0x44d   : > { %v962_v30 = vld [vmem:[#allocation3 + $0x5b0] sm:$0xff]  ;;  %v969_v54 = vld [vmem:[#allocation3 + $0x5e8] sm:$0xff] }
 0x44e   : > { %2456 = vmatpush1.bf16.msra.mxu1 %v2455_v61  ;;  %v941_v61 = vld [vmem:[#allocation3 + $0x508] sm:$0xff]  ;;  %v966_v22 = vld [vmem:[#allocation3 + $0x5d0] sm:$0xff] }
 0x44f   : > { %2584 = vmatpush1.bf16.msra.mxu0 %v2583_v62  ;;  %2458 = vmatprep.subr.bf16.mxu1 %v2457_v0  ;;  %v945_v62 = vld [vmem:[#allocation3 + $0x528] sm:$0xff]  ;;  %v947_v0 = vld [vmem:[#allocation3 + $0x538] sm:$0xff]  ;;  %v970_v60 = vld [vmem:[#allocation3 + $0x5f0] sm:$0xff] }
 0x450   : > { %2586 = vmatprep.subr.bf16.mxu0 %v2585_v6  ;;  %v2473_v6 = vpack.c.bf16 %v945_v62, %v941_v61  ;;  %v2601_v14 = vpack.c.bf16 %v947_v0, %v943_v63  ;;  %v973_v61 = vld [vmem:[#allocation3 + $0x608] sm:$0xff]  ;;  %v975_v63 = vld [vmem:[#allocation3 + $0x618] sm:$0xff]  ;;  %v974_v13 = vld [vmem:[#allocation3 + $0x610] sm:$0xff] }
 0x451   : > { %1641 = vmatmul.mubr.f32.vlgmr.msra.gmra.mrb[4].mxu1 %v711_v23  ;;  %v977_v62 = vld [vmem:[#allocation3 + $0x628] sm:$0xff]  ;;  %v979_v0 = vld [vmem:[#allocation3 + $0x638] sm:$0xff]  ;;  %v978_v15 = vld [vmem:[#allocation3 + $0x630] sm:$0xff] }
 0x452   : > { %1783 = vmatmul.mubr.f32.vlgmr.msra.gmra.mrb[2].mxu0 %v711_v23  ;;  %2460 = vmatpush1.bf16.msra.mxu1 %v2459_v18  ;;  %v949_v18 = vld [vmem:[#allocation3 + $0x548] sm:$0xff]  ;;  %v955_v23 = vld [vmem:[#allocation3 + $0x578] sm:$0xff] }
 0x453   : > { %1711 = vmatprep.mubr.f32.mxu1 %v738_v11  ;;  %2588 = vmatpush1.bf16.msra.mxu0 %v2587_v24  ;;  %v2475_v24 = vpack.c.bf16 %v944_v8, %v940_v7  ;;  %v2477_v27 = vpack.c.bf16 %v953_v20, %v949_v18  ;;  %v2605_v33 = vpack.c.bf16 %v955_v23, %v951_v21  ;;  %v972_v7 = vld [vmem:[#allocation3 + $0x600] sm:$0xff]  ;;  %v981_v18 = vld [vmem:[#allocation3 + $0x648] sm:$0xff]  ;;  %v983_v21 = vld [vmem:[#allocation3 + $0x658] sm:$0xff] }
 0x454   : > { %1853 = vmatprep.mubr.f32.mxu0 %v738_v11  ;;  %2462 = vmatprep.subr.bf16.mxu1 %v2461_v39  ;;  %v952_v39 = vld [vmem:[#allocation3 + $0x560] sm:$0xff]  ;;  %v957_v11 = vld [vmem:[#allocation3 + $0x588] sm:$0xff]  ;;  %v987_v23 = vld [vmem:[#allocation3 + $0x678] sm:$0xff] }
 0x455   : > { %2590 = vmatprep.subr.bf16.mxu0 %v2589_v44  ;;  %v961_v44 = vld [vmem:[#allocation3 + $0x5a8] sm:$0xff]  ;;  %v976_v8 = vld [vmem:[#allocation3 + $0x620] sm:$0xff] }
 0x456   : > { %2464 = vmatpush1.bf16.msra.mxu1 %v2463_v35  ;;  %v2479_v35 = vpack.c.bf16 %v952_v39, %v948_v28  ;;  %v985_v20 = vld [vmem:[#allocation3 + $0x668] sm:$0xff]  ;;  %v980_v28 = vld [vmem:[#allocation3 + $0x640] sm:$0xff] }
 0x457   : > { %2592 = vmatpush1.bf16.msra.mxu0 %v2591_v50  ;;  %2466 = vmatprep.subr.bf16.mxu1 %v2465_v51  ;;  %v2607_v50 = vpack.c.bf16 %v954_v42, %v950_v32  ;;  %v2481_v51 = vpack.c.bf16 %v961_v44, %v957_v11  ;;  %v984_v39 = vld [vmem:[#allocation3 + $0x660] sm:$0xff]  ;;  %v982_v32 = vld [vmem:[#allocation3 + $0x650] sm:$0xff]  ;;  %v989_v11 = vld [vmem:[#allocation3 + $0x688] sm:$0xff] }
 0x458   : > { %2594 = vmatprep.subr.bf16.mxu0 %v2593_v36  ;;  %v2609_v36 = vpack.c.bf16 %v963_v19, %v959_v5  ;;  %v986_v42 = vld [vmem:[#allocation3 + $0x670] sm:$0xff]  ;;  %v993_v44 = vld [vmem:[#allocation3 + $0x6a8] sm:$0xff]  ;;  %v991_v5 = vld [vmem:[#allocation3 + $0x698] sm:$0xff] }
 0x459   : > { %v995_v19 = vld [vmem:[#allocation3 + $0x6b8] sm:$0xff] }
 0x45a   : > { %2468 = vmatpush1.bf16.msra.mxu1 %v2467_v56  ;;  %v2483_v56 = vpack.c.bf16 %v960_v16, %v956_v52  ;;  %v2497_v52 = vpack.c.bf16 %v993_v44, %v989_v11  ;;  %v988_v16 = vld [vmem:[#allocation3 + $0x680] sm:$0xff] }
 0x45b   : > { %2596 = vmatpush1.bf16.msra.mxu0 %v2595_v57  ;;  %2470 = vmatprep.subr.bf16.mxu1 %v2469_v34  ;;  %v2611_v57 = vpack.c.bf16 %v962_v30, %v958_v12  ;;  %v2485_v34 = vpack.c.bf16 %v969_v54, %v965_v41  ;;  %v992_v12 = vld [vmem:[#allocation3 + $0x6a0] sm:$0xff]  ;;  %v2625_v30 = vpack.c.bf16 %v995_v19, %v991_v5  ;;  %v994_v41 = vld [vmem:[#allocation3 + $0x6b0] sm:$0xff]  ;;  %v997_v54 = vld [vmem:[#allocation3 + $0x6c8] sm:$0xff] }
 0x45c   : > { %2598 = vmatprep.subr.bf16.mxu0 %v2597_v46  ;;  %v2613_v46 = vpack.c.bf16 %v971_v55, %v967_v17  ;;  %v1001_v17 = vld [vmem:[#allocation3 + $0x6e8] sm:$0xff]  ;;  %v1012_v11 = vld [vmem:[#allocation3 + $0x740] sm:$0xff]  ;;  %v1014_v5 = vld [vmem:[#allocation3 + $0x750] sm:$0xff] }
 0x45d   : > { %v1016_v44 = vld [vmem:[#allocation3 + $0x760] sm:$0xff] }
 0x45e   : > { %2472 = vmatpush1.bf16.msra.mxu1 %v2471_v1  ;;  %v2487_v1 = vpack.c.bf16 %v968_v59, %v964_v58 }
 0x45f   : > { %2600 = vmatpush1.bf16.msra.mxu0 %v2599_v2  ;;  %2474 = vmatprep.subr.bf16.mxu1 %v2473_v6  ;;  %v2615_v2 = vpack.c.bf16 %v970_v60, %v966_v22  ;;  %v2489_v6 = vpack.c.bf16 %v977_v62, %v973_v61  ;;  %v2501_v22 = vpack.c.bf16 %v1001_v17, %v997_v54  ;;  %v1000_v60 = vld [vmem:[#allocation3 + $0x6e0] sm:$0xff]  ;;  %v998_v61 = vld [vmem:[#allocation3 + $0x6d0] sm:$0xff] }
 0x460   : > { %2602 = vmatprep.subr.bf16.mxu0 %v2601_v14  ;;  %v2617_v14 = vpack.c.bf16 %v979_v0, %v975_v63  ;;  %v1002_v63 = vld [vmem:[#allocation3 + $0x6f0] sm:$0xff]  ;;  %v1005_v0 = vld [vmem:[#allocation3 + $0x708] sm:$0xff]  ;;  %v1024_v54 = vld [vmem:[#allocation3 + $0x7a0] sm:$0xff] }
 0x461   : > { %v1022_v17 = vld [vmem:[#allocation3 + $0x790] sm:$0xff] }
 0x462   : > { %2476 = vmatpush1.bf16.msra.mxu1 %v2475_v24  ;;  %v2491_v24 = vpack.c.bf16 %v976_v8, %v972_v7 }
 0x463   : > { %2604 = vmatpush1.bf16.msra.mxu0 %v2603_v25  ;;  %2478 = vmatprep.subr.bf16.mxu1 %v2477_v27  ;;  %v2619_v25 = vpack.c.bf16 %v978_v15, %v974_v13  ;;  %v2493_v27 = vpack.c.bf16 %v985_v20, %v981_v18  ;;  %v2631_v13 = vpack.c.bf16 %v1002_v63, %v998_v61  ;;  %v1004_v15 = vld [vmem:[#allocation3 + $0x700] sm:$0xff]  ;;  %v1006_v20 = vld [vmem:[#allocation3 + $0x710] sm:$0xff] }
 0x464   : > { %2606 = vmatprep.subr.bf16.mxu0 %v2605_v33  ;;  %v2621_v33 = vpack.c.bf16 %v987_v23, %v983_v21  ;;  %v1008_v18 = vld [vmem:[#allocation3 + $0x720] sm:$0xff]  ;;  %v1010_v23 = vld [vmem:[#allocation3 + $0x730] sm:$0xff] }
 0x465   : > { %v1032_v63 = vld [vmem:[#allocation3 + $0x7e0] sm:$0xff] }
 0x466   : > { %2480 = vmatpush1.bf16.msra.mxu1 %v2479_v35  ;;  %v2495_v35 = vpack.c.bf16 %v984_v39, %v980_v28  ;;  %v1019_v28 = vld [vmem:[#allocation3 + $0x778] sm:$0xff]  ;;  %v2507_v39 = vpack.c.bf16 %v1008_v18, %v1004_v15  ;;  %v1861_v15 = vstv %s1860_s20 }
 0x467   : > { %2608 = vmatpush1.bf16.msra.mxu0 %v2607_v50  ;;  %2482 = vmatprep.subr.bf16.mxu1 %v2481_v51  ;;  %v721_v50 = vmax.f32 %v3136_v31, %v3140_v48  ;;  %v2623_v51 = vpack.c.bf16 %v986_v42, %v982_v32 }
 0x468   : > { %2610 = vmatprep.subr.bf16.mxu0 %v2609_v36  ;;  %v990_v36 = vld [vmem:[#allocation3 + $0x690] sm:$0xff] }
 0x469   : > { %v722_v55 = vmax.f32 %v721_v50, %v3144_v49  ;;  %v2627_v59 = vpack.c.bf16 %v994_v41, %v990_v36  ;;  %v1021_v50 = vld [vmem:[#allocation3 + $0x788] sm:$0xff]  ;;  %v1020_v41 = vld [vmem:[#allocation3 + $0x780] sm:$0xff] }
 0x46a   : > { %2484 = vmatpush1.bf16.msra.mxu1 %v2483_v56  ;;  %v999_v56 = vld [vmem:[#allocation3 + $0x6d8] sm:$0xff] }
 0x46b   : > { %2612 = vmatpush1.bf16.msra.mxu0 %v2611_v57  ;;  %2486 = vmatprep.subr.bf16.mxu1 %v2485_v34  ;;  %v1003_v57 = vld [vmem:[#allocation3 + $0x6f8] sm:$0xff]  ;;  %v2499_v34 = vpack.c.bf16 %v992_v12, %v988_v16  ;;  %v723_v58 = vmax.f32 %v722_v55, %v3150_v53  ;;  %v2511_v12 = vpack.c.bf16 %v1016_v44, %v1012_v11 }
 0x46c   : > { %2614 = vmatprep.subr.bf16.mxu0 %v2613_v46  ;;  %v996_v46 = vld [vmem:[#allocation3 + $0x6c0] sm:$0xff]  ;;  %v2629_v62 = vpack.c.bf16 %v1003_v57, %v999_v56  ;;  %v1027_v16 = vld [vmem:[#allocation3 + $0x7b8] sm:$0xff]  ;;  %v1026_v57 = vld [vmem:[#allocation3 + $0x7b0] sm:$0xff] }
 0x46d   : > { %v2503_v7 = vpack.c.bf16 %v1000_v60, %v996_v46  ;;  %v724_v8 = vrot.slane %v723_v58, 4  ;;  %v2515_v46 = vpack.c.bf16 %v1024_v54, %v1020_v41  ;;  %v2643_v60 = vpack.c.bf16 %v1026_v57, %v1022_v17 }
 0x46e   : > { %2488 = vmatpush1.bf16.msra.mxu1 %v2487_v1  ;;  %v1009_v1 = vld [vmem:[#allocation3 + $0x728] sm:$0xff] }
 0x46f   : > { %2616 = vmatpush1.bf16.msra.mxu0 %v2615_v2  ;;  %2490 = vmatprep.subr.bf16.mxu1 %v2489_v6  ;;  %v1007_v2 = vld [vmem:[#allocation3 + $0x718] sm:$0xff]  ;;  %v725_v32 = vmax.f32 %v723_v58, %v724_v8  ;;  %v1033_v58 = vld [vmem:[#allocation3 + $0x7e8] sm:$0xff] }
 0x470   : > { %2618 = vmatprep.subr.bf16.mxu0 %v2617_v14  ;;  %v1011_v6 = vld [vmem:[#allocation3 + $0x738] sm:$0xff]  ;;  %v2505_v14 = vpack.c.bf16 %v1009_v1, %v1005_v0 }
 0x471   : > { %v2633_v21 = vpack.c.bf16 %v1011_v6, %v1007_v2  ;;  %v726_v55 = vrot.slane %v725_v32, 2  ;;  %v1030_v2 = vld [vmem:[#allocation3 + $0x7d0] sm:$0xff] }
 0x472   : > { %2492 = vmatpush1.bf16.msra.mxu1 %v2491_v24  ;;  %v1013_v24 = vld [vmem:[#allocation3 + $0x748] sm:$0xff]  ;;  %v1034_v6 = vld [vmem:[#allocation3 + $0x7f0] sm:$0xff] }
 0x473   : > { %2620 = vmatpush1.bf16.msra.mxu0 %v2619_v25  ;;  %2494 = vmatprep.subr.bf16.mxu1 %v2493_v27  ;;  %v1017_v25 = vld [vmem:[#allocation3 + $0x768] sm:$0xff]  ;;  %v1015_v27 = vld [vmem:[#allocation3 + $0x758] sm:$0xff]  ;;  %v727_v0 = vmax.f32 %v725_v32, %v726_v55  ;;  %v2647_v8 = vpack.c.bf16 %v1034_v6, %v1030_v2 }
 0x474   : > { %2622 = vmatprep.subr.bf16.mxu0 %v2621_v33  ;;  %v2635_v33 = vpack.c.bf16 %v1010_v23, %v1006_v20  ;;  %v2509_v42 = vpack.c.bf16 %v1017_v25, %v1013_v24  ;;  %v2637_v19 = vpack.c.bf16 %v1019_v28, %v1015_v27 }
 0x476   : > { %2496 = vmatpush1.bf16.msra.mxu1 %v2495_v35  ;;  %v1018_v35 = vld [vmem:[#allocation3 + $0x770] sm:$0xff] }
 0x477   : > { %2624 = vmatpush1.bf16.msra.mxu0 %v2623_v51  ;;  %2498 = vmatprep.subr.bf16.mxu1 %v2497_v52  ;;  %v1025_v51 = vld [vmem:[#allocation3 + $0x7a8] sm:$0xff]  ;;  %v1023_v52 = vld [vmem:[#allocation3 + $0x798] sm:$0xff]  ;;  %v2639_v36 = vpack.c.bf16 %v1018_v35, %v1014_v5  ;;  %v1890_v35 = vlaneseq }
 0x478   : > { %2626 = vmatprep.subr.bf16.mxu0 %v2625_v30  ;;  %v2513_v30 = vpack.c.bf16 %v1025_v51, %v1021_v50  ;;  %v2641_v56 = vpack.c.bf16 %v1027_v16, %v1023_v52 }
 0x47a   : > { %2500 = vmatpush1.bf16.msra.mxu1 %v2499_v34  ;;  %v1029_v34 = vld [vmem:[#allocation3 + $0x7c8] sm:$0xff] }
 0x47b   : > { %2628 = vmatpush1.bf16.msra.mxu0 %v2627_v59  ;;  %2502 = vmatprep.subr.bf16.mxu1 %v2501_v22  ;;  %v1031_v59 = vld [vmem:[#allocation3 + $0x7d8] sm:$0xff]  ;;  %v2517_v61 = vpack.c.bf16 %v1033_v58, %v1029_v34 }
 0x47c   : > { %2630 = vmatprep.subr.bf16.mxu0 %v2629_v62  ;;  %v1035_v22 = vld [vmem:[#allocation3 + $0x7f8] sm:$0xff]  ;;  %v1028_v62 = vld [vmem:[#allocation3 + $0x7c0] sm:$0xff] }
 0x47d   : > { %v2645_v1 = vpack.c.bf16 %v1035_v22, %v1031_v59 }
 0x47e   : > { %2504 = vmatpush1.bf16.msra.mxu1 %v2503_v7  ;;  %v2519_v7 = vpack.c.bf16 %v1032_v63, %v1028_v62 }
 0x47f   : > { %2632 = vmatpush1.bf16.msra.mxu0 %v2631_v13  ;;  %2506 = vmatprep.subr.bf16.mxu1 %v2505_v14  ;;  %v728_v13 = vrot.slane %v727_v0, 1 }
 0x480   : > { %2634 = vmatprep.subr.bf16.mxu0 %v2633_v21 }
 0x481   : > { %v729_v14 = vmax.f32 %v727_v0, %v728_v13 }
 0x482   : > { %2508 = vmatpush1.bf16.msra.mxu1 %v2507_v39 }
 0x483   : > { %2636 = vmatpush1.bf16.msra.mxu0 %v2635_v33  ;;  %2510 = vmatprep.subr.bf16.mxu1 %v2509_v42 }
 0x484   : > { %2638 = vmatprep.subr.bf16.mxu0 %v2637_v19 }
 0x486   : > { %2512 = vmatpush1.bf16.msra.mxu1 %v2511_v12  ;;  %v1891_v12 = vshrl.u32 %v1890_v35, 7 }
 0x487   : > { %2640 = vmatpush1.bf16.msra.mxu0 %v2639_v36  ;;  %2514 = vmatprep.subr.bf16.mxu1 %v2513_v30 }
 0x488   : > { %2642 = vmatprep.subr.bf16.mxu0 %v2641_v56  ;;  %v1892_v36 = vsub.s32 0, %v1891_v12 }
 0x48a   : > { %2516 = vmatpush1.bf16.msra.mxu1 %v2515_v46 }
 0x48b   : > { %2644 = vmatpush1.bf16.msra.mxu0 %v2643_v60  ;;  %2518 = vmatprep.subr.bf16.mxu1 %v2517_v61 }
 0x48c   : > { %2646 = vmatprep.subr.bf16.mxu0 %v2645_v1 }
 0x48e   : > { %2520 = vmatpush1.bf16.msra.mxu1 %v2519_v7 }
 0x48f   : > { %2648 = vmatpush1.bf16.msra.mxu0 %v2647_v8 }
 0x491   : > { %1712 = vmatmul.mubr.f32.vlgmr.msra.gmra.mrb[4].mxu1 %v729_v14 }
 0x492   : > { %1854 = vmatmul.mubr.f32.vlgmr.msra.gmra.mrb[2].mxu0 %v729_v14 }
 0x564   : > { %v1713_v18 = vpop.f32.mrb[4].mxu1 }
 0x565   : > { %v1862_v20 = vadd.f32 %v1861_v15, %v1713_v18  ;;  %v1855_v21 = vpop.f32.mrb[2].mxu0  ;;  %v1715_v23 = vpop.f32.mrb[5].mxu1 }
 0x566   : > { %v1864_v24 = vadd.f32 %v1861_v15, %v1855_v21  ;;  %v1863_v25 = vadd.f32 %v1861_v15, %v1715_v23  ;;  %v1857_v27 = vpop.f32.mrb[3].mxu0 }
 0x567   : > { %v2078_v28 = vmul.f32 -1.442695, %v1862_v20  ;;  %v1865_v39 = vadd.f32 %v1861_v15, %v1857_v27 }
 0x568   : > { %v2080_v32 = vmul.f32 -1.442695, %v1864_v24  ;;  %v2079_v33 = vmul.f32 -1.442695, %v1863_v25 }
 0x569   : > { %2715 = vpow2.f32 %v2078_v28  ;;  %v2081_v42 = vmul.f32 -1.442695, %v1865_v39 }
 0x56a   : > { %2717 = vpow2.f32 %v2080_v32 }
 0x56b   : > { %2719 = vpow2.f32 %v2079_v33 }
 0x56c   : > { %2721 = vpow2.f32 %v2081_v42 }
 0x573   : > { %v2716_v11 = vpop.eup %2715 }
 0x574   : > { %v2718_v44 = vpop.eup %2717  ;;  %v1878_v5 = vadd.f32 1.0, %v2716_v11 }
 0x575   : > { %v2720_v19 = vpop.eup %2719  ;;  %v1880_v50 = vadd.f32 1.0, %v2718_v44 }
 0x576   : > { %v2722_v51 = vpop.eup %2721  ;;  %2723 = vrcp.f32 %v1878_v5  ;;  %v1879_v52 = vadd.f32 1.0, %v2720_v19 }
 0x577   : > { %2725 = vrcp.f32 %v1880_v50  ;;  %v1881_v16 = vadd.f32 1.0, %v2722_v51 }
 0x578   : > { %2727 = vrcp.f32 %v1879_v52 }
 0x579   : > { %2729 = vrcp.f32 %v1881_v16 }
 0x580   : > { %v2724_v30 = vpop.eup %2723 }
 0x581   : > { %v2726_v41 = vpop.eup %2725  ;;  %v1893_v54 = vrot.slane %v2724_v30, %v1892_v36 }
 0x582   : > { %v2728_v17 = vpop.eup %2727  ;;  %v1901_v55 = vrot.slane %v2726_v41, %v1892_v36 }
 0x583   : > { %v2730_v56 = vpop.eup %2729  ;;  %v1906_v57 = vmul.f32 %v1893_v54, %v3072_v37  ;;  %v1910_v34 = vmul.f32 %v1893_v54, %v3086_v43  ;;  %v1914_v58 = vmul.f32 %v1893_v54, %v3098_v4  ;;  %v1918_v59 = vmul.f32 %v1893_v54, %v3118_v26 }
 0x584   : > { %v1897_v22 = vrot.slane %v2728_v17, %v1892_v36  ;;  %v1905_v46 = vrot.slane %v2730_v56, %v1892_v36  ;;  %v1908_v60 = vmul.f32 %v1901_v55, %v3136_v31  ;;  %v1912_v61 = vmul.f32 %v1901_v55, %v3140_v48 }
 0x585   : > { %v1916_v62 = vmul.f32 %v1901_v55, %v3144_v49  ;;  %v1920_v63 = vmul.f32 %v1901_v55, %v3150_v53 }
 0x586   : > { %v1907_v0 = vmul.f32 %v1897_v22, %v3076_v45  ;;  %v1911_v37 = vmul.f32 %v1897_v22, %v3090_v47  ;;  %v1915_v43 = vmul.f32 %v1897_v22, %v3102_v9  ;;  %v1919_v4 = vmul.f32 %v1897_v22, %v3122_v29 }
 0x587   : > { %v1909_v26 = vmul.f32 %v1905_v46, %v3080_v40  ;;  %v1913_v31 = vmul.f32 %v1905_v46, %v3094_v3  ;;  %v1917_v48 = vmul.f32 %v1905_v46, %v3106_v10  ;;  %v1921_v49 = vmul.f32 %v1905_v46, %v3126_v38 }
 0x588   : > { %v2094_v45 = vpack.c.bf16 %v1907_v0, %v1906_v57  ;;  %v2096_v53 = vpack.c.bf16 %v1911_v37, %v1910_v34  ;;  %v2098_v47 = vpack.c.bf16 %v1915_v43, %v1914_v58  ;;  %v2100_v1 = vpack.c.bf16 %v1919_v4, %v1918_v59 }
 0x589   : > { %v2095_v9 = vpack.c.bf16 %v1909_v26, %v1908_v60  ;;  %v2097_v2 = vpack.c.bf16 %v1913_v31, %v1912_v61  ;;  %v2099_v29 = vpack.c.bf16 %v1917_v48, %v1916_v62  ;;  %v2101_v6 = vpack.c.bf16 %v1921_v49, %v1920_v63 }
 0x58a   : > { %1970 = vst [vmem:[%s336_s23] sm:$0xff] %v2094_v45  ;;  %1972 = vst [vmem:[%s336_s23 + $0x10] sm:$0xff] %v2096_v53 }
 0x58b   : > { %1974 = vst [vmem:[%s336_s23 + $0x20] sm:$0xff] %v2098_v47  ;;  %1976 = vst [vmem:[%s336_s23 + $0x30] sm:$0xff] %v2100_v1 }
 0x58c   : > { %1971 = vst [vmem:[%s336_s23 + $0x8] sm:$0xff] %v2095_v9  ;;  %1973 = vst [vmem:[%s336_s23 + $0x18] sm:$0xff] %v2097_v2 }
 0x58d   : > { %1975 = vst [vmem:[%s336_s23 + $0x28] sm:$0xff] %v2099_v29  ;;  %1977 = vst [vmem:[%s336_s23 + $0x38] sm:$0xff] %v2101_v6 }
 0x58e PF: > { %s21_s29 = sadd.s32 1, %s2801_s29  }
 0x58f   : > { %p18_p5 = scmp.ge.s32.totalorder %s21_s29, 4  }
 0x591   :  { %20 = sbr.rel (!%p18_p5) target bundleno = 4 (0x4), region = 91 }
 0x598   :  { %1999 = vsyncpa [#allocation4], 1 }
 0x599   :  { %2001 = vsyncpa [#allocation4 + $0x1], 1 }
 0x59a   :  { %2002 = vsyncpa [#allocation6], 1 }

</bundles_post_ra>
